<compile_context>
chip_gen: v7x
topology: tpu7x:2x2x1
jax: 0.10.0
libtpu: 0.0.40
codegen_flags: <defaults>
</compile_context>

<pallas_src>
import functools
import math

import jax
import jax.numpy as jnp
from jax.experimental import pallas as pl
from jax.experimental.pallas import tpu as pltpu


def encoder_layer_kernel(
    x_ref, pos_ref,
    wq_ref, bq_ref, wk_ref, bk_ref, wv_ref, bv_ref,
    wc_ref, bc_ref,
    g1_ref, be1_ref,
    wf1_ref, bf1_ref, wf2_ref, bf2_ref,
    g2_ref, be2_ref,
    o_ref,
    k_scr, v_scr,
    *, n_head, tile_l, n_t2, valid_len,
):
  L = x_ref.shape[0]          # padded sequence length
  D = x_ref.shape[1]
  dh = D // n_head
  c = pl.program_id(1)        # core-chunk index (parallel axis)
  t = pl.program_id(2)        # query-tile index within the chunk (sequential)

  def matmul(a_bf16, w_ref, b_ref):
    # bf16 MXU operands, f32 accumulation, f32 bias add.
    return jnp.dot(a_bf16, w_ref[...],
                   preferred_element_type=jnp.float32) + b_ref[...]

  # ---- K/V for the whole (padded) row: computed once per (row, core-chunk)
  #      and cached in VMEM scratch across that chunk's query tiles.
  #      K is stored head-split AND transposed (H, dh, L): dense in VMEM and
  #      already in the natural MXU orientation for the score matmul. ----
  @pl.when(t == 0)
  def _():
    h_full = x_ref[...].astype(jnp.float32) + pos_ref[...].astype(jnp.float32)
    h_bf = h_full.astype(jnp.bfloat16)            # cast once, reused for K & V
    k2 = matmul(h_bf, wk_ref, bk_ref)             # (L, D) f32
    v2 = matmul(h_bf, wv_ref, bv_ref)             # (L, D) f32
    k_scr[...] = jnp.transpose(k2, (1, 0)).reshape(
        n_head, dh, L).astype(jnp.bfloat16)       # (H, dh, L)
    v_scr[...] = jnp.transpose(v2.reshape(L, n_head, dh),
                               (1, 0, 2)).astype(jnp.bfloat16)   # (H, L, dh)

  # ---- Query tile of the layer input h = x + pos ----
  row0 = pl.multiple_of((c * n_t2 + t) * tile_l, tile_l)
  h_t = (x_ref[pl.ds(row0, tile_l), :].astype(jnp.float32)
         + pos_ref[pl.ds(row0, tile_l), :].astype(jnp.float32))   # (tile_l, D)

  # 1/sqrt(dh) is pre-folded into wq / bq on the host.
  q2 = matmul(h_t.astype(jnp.bfloat16), wq_ref, bq_ref)           # (tile_l, D)
  q3 = jnp.transpose(q2.reshape(tile_l, n_head, dh),
                     (1, 0, 2)).astype(jnp.bfloat16)              # (H, tile_l, dh)

  # ---- Head-batched scaled-dot-product attention ----
  s = jnp.einsum('hqd,hdk->hqk', q3, k_scr[...],
                 preferred_element_type=jnp.float32)              # (H, tile_l, L) f32
  if valid_len < L:  # static: mask padded key positions
    key_idx = jax.lax.broadcasted_iota(jnp.int32, (1, 1, L), 2)
    s = jnp.where(key_idx < valid_len, s, -1e30)
  s = s - jnp.max(s, axis=-1, keepdims=True)
  p = jnp.exp(s)
  p = p * pl.reciprocal(jnp.sum(p, axis=-1, keepdims=True), approx=True)
  o3 = jnp.einsum('hqk,hkd->hqd', p.astype(jnp.bfloat16), v_scr[...],
                  preferred_element_type=jnp.float32)             # (H, tile_l, dh)

  # merge heads back to (tile_l, D)  (== torch .transpose(1,2).view(...))
  attn = jnp.transpose(o3, (1, 0, 2)).reshape(tile_l, D)
  attn = matmul(attn.astype(jnp.bfloat16), wc_ref, bc_ref)        # w_concat proj

  def layernorm(inp, g_ref, b_ref):
    mu = jnp.mean(inp, axis=-1, keepdims=True)
    var = jnp.mean((inp - mu) ** 2, axis=-1, keepdims=True)
    return (inp - mu) * jax.lax.rsqrt(var + 1e-5) * g_ref[...] + b_ref[...]

  # residual + norm1   (dropout1 = identity at inference)
  x1 = layernorm(attn + h_t, g1_ref, be1_ref)

  # ---- FeedForward: Linear -> ReLU -> Linear ----
  # TODO(synk): `FeedForward` is not defined in the provided snippet; assumed
  # the standard DETR FFN Linear(d, 4d) -> ReLU -> Linear(4d, d).
  ff = matmul(x1.astype(jnp.bfloat16), wf1_ref, bf1_ref)
  ff = jnp.maximum(ff, 0.0)
  ff = matmul(ff.astype(jnp.bfloat16), wf2_ref, bf2_ref)

  # residual + norm2   (dropout2 = identity at inference)
  x2 = layernorm(ff + x1, g2_ref, be2_ref)

  o_ref[...] = x2.astype(o_ref.dtype)


def _round_up(x, m):
  return ((x + m - 1) // m) * m


def _vmem_capacity_bytes():
  try:
    return int(pltpu.get_tpu_info().vmem_capacity_bytes)
  except Exception:
    return 64 << 20   # conservative (v7x-sized) fallback


def _vmem_limit_bytes(L_pad, D, n_head, tile_l, vmem_cap):
  """Size the scoped-VMEM limit from the actual buffer footprint."""
  dh = D // n_head
  lane = lambda n: _round_up(n, 128)
  est = (
      2 * 2 * L_pad * lane(D) * 4               # x & pos full-row blocks, 2 bufs, f32
      + 2 * tile_l * lane(D) * 4                # output tile, 2 bufs, f32
      + 2 * 2 * (12 * D * lane(D)) * 2          # matmul weights (QKVO + FFN) bf16, 2 bufs
      + n_head * _round_up(dh, 8) * lane(L_pad) * 2   # K^T scratch (dense)
      + n_head * L_pad * lane(dh) * 2           # V scratch (lane-padded minor dh)
      + 3 * n_head * tile_l * lane(L_pad) * 4   # score temporaries (s / exp / p) f32
      + 2 * tile_l * lane(4 * D) * 4            # FFN intermediate f32
      + (8 << 20)                               # headroom for compiler temporaries
  )
  return max(32 << 20, min(int(est), int(vmem_cap * 4 // 5)))


def run_encoder_layer(x, pos_emb, params, n_head, tile_l, valid_len, vmem_cap):
  """x / pos_emb are already padded so that L_pad % tile_l == 0."""
  B, L_pad, D = x.shape
  assert D % n_head == 0 and L_pad % tile_l == 0
  dh = D // n_head
  n_tiles = L_pad // tile_l
  # Core-parallel split of the query tiles (keeps v7x's 2 TensorCores busy at
  # small B); each chunk recomputes the cheap K/V projection into its own
  # scratch.  Harmless on single-core v5e/v6e.
  n_core_chunks = 2 if (n_tiles % 2 == 0 and n_tiles >= 2) else 1
  n_t2 = n_tiles // n_core_chunks

  scale = 1.0 / math.sqrt(dh)

  def bf16(a):
    return a.astype(jnp.bfloat16)

  # Matmul weights in bf16 (MXU operands); biases / LN params stay f32.
  # 1/sqrt(dh) attention scale folded into the Q projection on the host.
  param_list = [
      bf16(params["wq"] * scale), params["bq"] * scale,
      bf16(params["wk"]), params["bk"],
      bf16(params["wv"]), params["bv"],
      bf16(params["wc"]), params["bc"],
      params["g1"], params["be1"],
      bf16(params["wf1"]), params["bf1"],
      bf16(params["wf2"]), params["bf2"],
      params["g2"], params["be2"],
  ]

  def full_spec(a):
    nd = a.ndim
    return pl.BlockSpec(a.shape, lambda b, c, t, _nd=nd: (0,) * _nd)

  in_specs = [
      # Full (padded) row of x / pos: block index is constant across the tile
      # axes (no re-DMA); query tiles are sliced in-kernel.
      pl.BlockSpec((pl.Squeezed(), L_pad, D), lambda b, c, t: (b, 0, 0)),  # x
      pl.BlockSpec((pl.Squeezed(), L_pad, D), lambda b, c, t: (b, 0, 0)),  # pos
  ] + [full_spec(a) for a in param_list]

  kernel = functools.partial(encoder_layer_kernel, n_head=n_head,
                             tile_l=tile_l, n_t2=n_t2, valid_len=valid_len)

  flops = int(B * (24 * L_pad * D * D + 4 * L_pad * L_pad * D))
  transcendentals = int(B * n_head * L_pad * L_pad + 2 * B * L_pad)
  bytes_accessed = int(4 * (3 * B * L_pad * D) + 2 * (12 * D * D))

  return pl.pallas_call(
      kernel,
      out_shape=jax.ShapeDtypeStruct((B, L_pad, D), x.dtype),
      grid_spec=pltpu.PrefetchScalarGridSpec(
          num_scalar_prefetch=0,
          grid=(B, n_core_chunks, n_t2),
          in_specs=in_specs,
          out_specs=pl.BlockSpec(
              (pl.Squeezed(), tile_l, D),
              lambda b, c, t, _n=n_t2: (b, c * _n + t, 0)),
          scratch_shapes=[
              pltpu.VMEM((n_head, dh, L_pad), jnp.bfloat16),   # K^T cache
              pltpu.VMEM((n_head, L_pad, dh), jnp.bfloat16),   # V cache
          ],
      ),
      compiler_params=pltpu.CompilerParams(
          # batch & core-chunk axes megacore-parallel; the query-tile axis is
          # sequential because the K/V scratch is filled at t == 0.
          dimension_semantics=("parallel", "parallel", "arbitrary"),
          vmem_limit_bytes=_vmem_limit_bytes(L_pad, D, n_head, tile_l, vmem_cap),
      ),
      cost_estimate=pl.CostEstimate(flops=flops,
                                    transcendentals=transcendentals,
                                    bytes_accessed=bytes_accessed),
  )(x, pos_emb, *param_list)


def run_encoder(x, pos_emb, layer_params, n_head, tile_l=None):
  B, L, D = x.shape
  vmem_cap = _vmem_capacity_bytes()
  if tile_l is None:
    # v7x has 64 MiB VMEM/core -> cap the query tile at 128; v5e/v6e -> 256.
    max_tile = 256 if vmem_cap >= (100 << 20) else 128
    tile_l = min(_round_up(L, 8), max_tile)
  assert tile_l % 8 == 0
  L_pad = _round_up(L, tile_l)
  if L_pad != L:
    pad = ((0, 0), (0, L_pad - L), (0, 0))
    xp, pp = jnp.pad(x, pad), jnp.pad(pos_emb, pad)
  else:
    xp, pp = x, pos_emb
  # TODO(synk): on v5e/v6e (128 MiB VMEM) pairs of layers could share one
  # pallas_call with weights resident; kept per-layer for v7x (64 MiB) safety.
  for p in layer_params:
    xp = run_encoder_layer(xp, pp, p, n_head, tile_l=tile_l,
                           valid_len=L, vmem_cap=vmem_cap)
  return xp[:, :L, :] if L_pad != L else xp


def init_layer_params(key, d_model, ffn_hidden):
  """Deterministic init; Linear weights stored as [in, out]."""
  ks = jax.random.split(key, 12)

  def lin(kw, kb, fan_in, fan_out):
    bound = 1.0 / jnp.sqrt(jnp.float32(fan_in))
    w = jax.random.uniform(kw, (fan_in, fan_out), jnp.float32, -bound, bound)
    b = jax.random.uniform(kb, (1, fan_out), jnp.float32, -bound, bound)
    return w, b

  wq, bq = lin(ks[0], ks[1], d_model, d_model)
  wk, bk = lin(ks[2], ks[3], d_model, d_model)
  wv, bv = lin(ks[4], ks[5], d_model, d_model)
  wc, bc = lin(ks[6], ks[7], d_model, d_model)
  wf1, bf1 = lin(ks[8], ks[9], d_model, ffn_hidden)
  wf2, bf2 = lin(ks[10], ks[11], ffn_hidden, d_model)
  return dict(
      wq=wq, bq=bq, wk=wk, bk=bk, wv=wv, bv=bv, wc=wc, bc=bc,
      g1=jnp.ones((1, d_model), jnp.float32),
      be1=jnp.zeros((1, d_model), jnp.float32),
      wf1=wf1, bf1=bf1, wf2=wf2, bf2=bf2,
      g2=jnp.ones((1, d_model), jnp.float32),
      be2=jnp.zeros((1, d_model), jnp.float32),
  )


if __name__ == "__main__":
  B, L, D = 2, 10, 32        # L deliberately NOT a multiple of 8: exercises
  N_HEAD = 4                 # the pad-to-tile + key-mask path. Real DETR uses
  N_LAYERS = 2               # D=256, H=8, L~850-1100 (lane-dense tiles).
  FFN_HIDDEN = 4 * D

  root = jax.random.PRNGKey(0)
  kx, kp, kw = jax.random.split(root, 3)
  x = jax.random.normal(kx, (B, L, D), jnp.float32)
  pos_emb = jax.random.normal(kp, (B, L, D), jnp.float32)

  layer_keys = jax.random.split(kw, N_LAYERS)
  layer_params = [init_layer_params(k, D, FFN_HIDDEN) for k in layer_keys]

  # tile_l=8 forces a multi-tile grid (2 query tiles -> 2 core chunks) even at
  # this toy size, exercising the K/V cache, core-split and padding paths.
  out = run_encoder(x, pos_emb, layer_params, N_HEAD, tile_l=8)
  out = jax.block_until_ready(out)
  assert out.shape == (B, L, D)
  assert bool(jnp.all(jnp.isfinite(out)))
  print("KERNEL_OK")
</pallas_src>

<mosaic_0001>
module attributes {stable_mosaic.version = 11 : i64} {
  func.func @encoder_layer_kernel(%arg0: i32, %arg1: i32, %arg2: i32, %arg3: memref<1x16x32xf32, #tpu.memory_space<vmem>>, %arg4: memref<1x16x32xf32, #tpu.memory_space<vmem>>, %arg5: memref<32x32xbf16, #tpu.memory_space<vmem>>, %arg6: memref<1x32xf32, #tpu.memory_space<vmem>>, %arg7: memref<32x32xbf16, #tpu.memory_space<vmem>>, %arg8: memref<1x32xf32, #tpu.memory_space<vmem>>, %arg9: memref<32x32xbf16, #tpu.memory_space<vmem>>, %arg10: memref<1x32xf32, #tpu.memory_space<vmem>>, %arg11: memref<32x32xbf16, #tpu.memory_space<vmem>>, %arg12: memref<1x32xf32, #tpu.memory_space<vmem>>, %arg13: memref<1x32xf32, #tpu.memory_space<vmem>>, %arg14: memref<1x32xf32, #tpu.memory_space<vmem>>, %arg15: memref<32x128xbf16, #tpu.memory_space<vmem>>, %arg16: memref<1x128xf32, #tpu.memory_space<vmem>>, %arg17: memref<128x32xbf16, #tpu.memory_space<vmem>>, %arg18: memref<1x32xf32, #tpu.memory_space<vmem>>, %arg19: memref<1x32xf32, #tpu.memory_space<vmem>>, %arg20: memref<1x32xf32, #tpu.memory_space<vmem>>, %arg21: memref<1x8x32xf32, #tpu.memory_space<vmem>>, %arg22: memref<4x8x16xbf16, #tpu.memory_space<vmem>>, %arg23: memref<4x16x8xbf16, #tpu.memory_space<vmem>>) attributes {dimension_semantics = [#tpu.dimension_semantics<parallel>, #tpu.dimension_semantics<parallel>, #tpu.dimension_semantics<arbitrary>], iteration_bounds = array<i64: 2, 2, 1>, scalar_prefetch = 0 : i64, scratch_operands = 2 : i64, tpu.core_type = #tpu.core_type<tc>, window_params = [{transform_indices = @transform_0, window_bounds = array<i64: 1, 16, 32>}, {transform_indices = @transform_1, window_bounds = array<i64: 1, 16, 32>}, {pipeline_mode = #tpu.pipeline_mode<synchronous>, transform_indices = @transform_2, window_bounds = array<i64: 32, 32>}, {pipeline_mode = #tpu.pipeline_mode<synchronous>, transform_indices = @transform_3, window_bounds = array<i64: 1, 32>}, {pipeline_mode = #tpu.pipeline_mode<synchronous>, transform_indices = @transform_4, window_bounds = array<i64: 32, 32>}, {pipeline_mode = #tpu.pipeline_mode<synchronous>, transform_indices = @transform_5, window_bounds = array<i64: 1, 32>}, {pipeline_mode = #tpu.pipeline_mode<synchronous>, transform_indices = @transform_6, window_bounds = array<i64: 32, 32>}, {pipeline_mode = #tpu.pipeline_mode<synchronous>, transform_indices = @transform_7, window_bounds = array<i64: 1, 32>}, {pipeline_mode = #tpu.pipeline_mode<synchronous>, transform_indices = @transform_8, window_bounds = array<i64: 32, 32>}, {pipeline_mode = #tpu.pipeline_mode<synchronous>, transform_indices = @transform_9, window_bounds = array<i64: 1, 32>}, {pipeline_mode = #tpu.pipeline_mode<synchronous>, transform_indices = @transform_10, window_bounds = array<i64: 1, 32>}, {pipeline_mode = #tpu.pipeline_mode<synchronous>, transform_indices = @transform_11, window_bounds = array<i64: 1, 32>}, {pipeline_mode = #tpu.pipeline_mode<synchronous>, transform_indices = @transform_12, window_bounds = array<i64: 32, 128>}, {pipeline_mode = #tpu.pipeline_mode<synchronous>, transform_indices = @transform_13, window_bounds = array<i64: 1, 128>}, {pipeline_mode = #tpu.pipeline_mode<synchronous>, transform_indices = @transform_14, window_bounds = array<i64: 128, 32>}, {pipeline_mode = #tpu.pipeline_mode<synchronous>, transform_indices = @transform_15, window_bounds = array<i64: 1, 32>}, {pipeline_mode = #tpu.pipeline_mode<synchronous>, transform_indices = @transform_16, window_bounds = array<i64: 1, 32>}, {pipeline_mode = #tpu.pipeline_mode<synchronous>, transform_indices = @transform_17, window_bounds = array<i64: 1, 32>}, {transform_indices = @transform_18, window_bounds = array<i64: 1, 8, 32>}]} {
    %c0_i32 = arith.constant 0 : i32
    %0 = arith.cmpi eq, %arg2, %c0_i32 : i32
    %1 = arith.extui %0 : i1 to i32
    %c0_i32_0 = arith.constant 0 : i32
    %2 = arith.cmpi ne, %1, %c0_i32_0 : i32
    scf.if %2 {
      %c0_56 = arith.constant 0 : index
      %c0_57 = arith.constant 0 : index
      %c0_58 = arith.constant 0 : index
      %120 = vector.load %arg3[%c0_56, %c0_57, %c0_58] : memref<1x16x32xf32, #tpu.memory_space<vmem>>, vector<1x16x32xf32>
      %121 = vector.shape_cast %120 : vector<1x16x32xf32> to vector<16x32xf32>
      %c0_59 = arith.constant 0 : index
      %c0_60 = arith.constant 0 : index
      %c0_61 = arith.constant 0 : index
      %122 = vector.load %arg4[%c0_59, %c0_60, %c0_61] : memref<1x16x32xf32, #tpu.memory_space<vmem>>, vector<1x16x32xf32>
      %123 = vector.shape_cast %122 : vector<1x16x32xf32> to vector<16x32xf32>
      %124 = arith.addf %121, %123 : vector<16x32xf32>
      %125 = arith.truncf %124 : vector<16x32xf32> to vector<16x32xbf16>
      %c0_62 = arith.constant 0 : index
      %c0_63 = arith.constant 0 : index
      %126 = vector.load %arg7[%c0_62, %c0_63] : memref<32x32xbf16, #tpu.memory_space<vmem>>, vector<32x32xbf16>
      %cst_64 = arith.constant dense<0.000000e+00> : vector<16x32xf32>
      %127 = tpu.matmul %125, %126, %cst_64 {dimension_numbers = #tpu.dot_dimension_numbers<[1], [0], [0], [1], [0, 0, 1, 1], [], []>} : vector<16x32xbf16>, vector<32x32xbf16>, vector<16x32xf32> -> vector<16x32xf32>
      %c0_65 = arith.constant 0 : index
      %c0_66 = arith.constant 0 : index
      %128 = vector.load %arg8[%c0_65, %c0_66] : memref<1x32xf32, #tpu.memory_space<vmem>>, vector<1x32xf32>
      %129 = vector.broadcast %128 : vector<1x32xf32> to vector<16x32xf32>
      %130 = arith.addf %127, %129 : vector<16x32xf32>
      %c0_67 = arith.constant 0 : index
      %c0_68 = arith.constant 0 : index
      %131 = vector.load %arg9[%c0_67, %c0_68] : memref<32x32xbf16, #tpu.memory_space<vmem>>, vector<32x32xbf16>
      %cst_69 = arith.constant dense<0.000000e+00> : vector<16x32xf32>
      %132 = tpu.matmul %125, %131, %cst_69 {dimension_numbers = #tpu.dot_dimension_numbers<[1], [0], [0], [1], [0, 0, 1, 1], [], []>} : vector<16x32xbf16>, vector<32x32xbf16>, vector<16x32xf32> -> vector<16x32xf32>
      %c0_70 = arith.constant 0 : index
      %c0_71 = arith.constant 0 : index
      %133 = vector.load %arg10[%c0_70, %c0_71] : memref<1x32xf32, #tpu.memory_space<vmem>>, vector<1x32xf32>
      %134 = vector.broadcast %133 : vector<1x32xf32> to vector<16x32xf32>
      %135 = arith.addf %132, %134 : vector<16x32xf32>
      %136 = tpu.transpose %130, [1, 0] : vector<16x32xf32> -> vector<32x16xf32>
      %137 = vector.shape_cast %136 : vector<32x16xf32> to vector<4x8x16xf32>
      %138 = arith.truncf %137 : vector<4x8x16xf32> to vector<4x8x16xbf16>
      %c0_72 = arith.constant 0 : index
      %c0_73 = arith.constant 0 : index
      %c0_74 = arith.constant 0 : index
      %139 = vector.load %arg22[%c0_72, %c0_73, %c0_74] : memref<4x8x16xbf16, #tpu.memory_space<vmem>>, vector<4x8x16xbf16>
      tpu.vector_store %arg22[%c0_72, %c0_73, %c0_74], %138 {strides = array<i32>} : memref<4x8x16xbf16, #tpu.memory_space<vmem>>, vector<4x8x16xbf16>,
      %140 = vector.shape_cast %135 : vector<16x32xf32> to vector<16x4x8xf32>
      %141 = tpu.transpose %140, [1, 0, 2] : vector<16x4x8xf32> -> vector<4x16x8xf32>
      %142 = arith.truncf %141 : vector<4x16x8xf32> to vector<4x16x8xbf16>
      %c0_75 = arith.constant 0 : index
      %c0_76 = arith.constant 0 : index
      %c0_77 = arith.constant 0 : index
      %143 = vector.load %arg23[%c0_75, %c0_76, %c0_77] : memref<4x16x8xbf16, #tpu.memory_space<vmem>>, vector<4x16x8xbf16>
      tpu.vector_store %arg23[%c0_75, %c0_76, %c0_77], %142 {strides = array<i32>} : memref<4x16x8xbf16, #tpu.memory_space<vmem>>, vector<4x16x8xbf16>,
    } else {
    }
    %c1_i32 = arith.constant 1 : i32
    %3 = arith.muli %arg1, %c1_i32 : i32
    %4 = arith.addi %3, %arg2 : i32
    %c8_i32 = arith.constant 8 : i32
    %5 = arith.muli %4, %c8_i32 : i32
    %6 = tpu.assume_multiple %5, 8 : i32
    %c0 = arith.constant 0 : index
    %7 = arith.index_cast %6 : i32 to index
    %c0_1 = arith.constant 0 : index
    %8 = vector.load %arg3[%c0, %7, %c0_1] : memref<1x16x32xf32, #tpu.memory_space<vmem>>, vector<1x8x32xf32>
    %9 = vector.shape_cast %8 : vector<1x8x32xf32> to vector<8x32xf32>
    %c0_2 = arith.constant 0 : index
    %10 = arith.index_cast %6 : i32 to index
    %c0_3 = arith.constant 0 : index
    %11 = vector.load %arg4[%c0_2, %10, %c0_3] : memref<1x16x32xf32, #tpu.memory_space<vmem>>, vector<1x8x32xf32>
    %12 = vector.shape_cast %11 : vector<1x8x32xf32> to vector<8x32xf32>
    %13 = arith.addf %9, %12 : vector<8x32xf32>
    %14 = arith.truncf %13 : vector<8x32xf32> to vector<8x32xbf16>
    %c0_4 = arith.constant 0 : index
    %c0_5 = arith.constant 0 : index
    %15 = vector.load %arg5[%c0_4, %c0_5] : memref<32x32xbf16, #tpu.memory_space<vmem>>, vector<32x32xbf16>
    %cst = arith.constant dense<0.000000e+00> : vector<8x32xf32>
    %16 = tpu.matmul %14, %15, %cst {dimension_numbers = #tpu.dot_dimension_numbers<[1], [0], [0], [1], [0, 0, 1, 1], [], []>} : vector<8x32xbf16>, vector<32x32xbf16>, vector<8x32xf32> -> vector<8x32xf32>
    %c0_6 = arith.constant 0 : index
    %c0_7 = arith.constant 0 : index
    %17 = vector.load %arg6[%c0_6, %c0_7] : memref<1x32xf32, #tpu.memory_space<vmem>>, vector<1x32xf32>
    %18 = vector.broadcast %17 : vector<1x32xf32> to vector<8x32xf32>
    %19 = arith.addf %16, %18 : vector<8x32xf32>
    %20 = vector.shape_cast %19 : vector<8x32xf32> to vector<8x4x8xf32>
    %21 = tpu.transpose %20, [1, 0, 2] : vector<8x4x8xf32> -> vector<4x8x8xf32>
    %22 = arith.truncf %21 : vector<4x8x8xf32> to vector<4x8x8xbf16>
    %c0_8 = arith.constant 0 : index
    %c0_9 = arith.constant 0 : index
    %c0_10 = arith.constant 0 : index
    %23 = vector.load %arg22[%c0_8, %c0_9, %c0_10] : memref<4x8x16xbf16, #tpu.memory_space<vmem>>, vector<4x8x16xbf16>
    "tpu.trace_start"() <{level = 10 : i32, message = "hqd,hdk->hqk"}> : () -> ()
    %cst_11 = arith.constant dense<0.000000e+00> : vector<4x8x16xf32>
    %24 = tpu.matmul %22, %23, %cst_11 {dimension_numbers = #tpu.dot_dimension_numbers<[2], [1], [1], [2], [0, 0, 0, 1, 1, 2], [0], [0]>} : vector<4x8x8xbf16>, vector<4x8x16xbf16>, vector<4x8x16xf32> -> vector<4x8x16xf32>
    "tpu.trace_stop"() : () -> ()
    %25 = tpu.iota {dimensions = array<i32: 2>} : vector<1x1x16xi32>
    %c10_i32 = arith.constant 10 : i32
    %26 = vector.broadcast %c10_i32 : i32 to vector<1x1x16xi32>
    %27 = arith.cmpi slt, %25, %26 : vector<1x1x16xi32>
    %cst_12 = arith.constant -1.000000e+30 : f32
    %28 = vector.shape_cast %27 : vector<1x1x16xi1> to vector<1x1x16xi1>
    %29 = vector.broadcast %28 : vector<1x1x16xi1> to vector<4x8x16xi1>
    %30 = vector.broadcast %cst_12 : f32 to vector<4x8x16xf32>
    %31 = arith.select %29, %24, %30 : vector<4x8x16xi1>, vector<4x8x16xf32>
    %cst_13 = arith.constant dense<0xFF800000> : vector<4x8xf32>
    %32 = vector.multi_reduction <maximumf>, %31, %cst_13 [2] : vector<4x8x16xf32> to vector<4x8xf32>
    %33 = vector.shape_cast %32 : vector<4x8xf32> to vector<4x8x1xf32>
    %34 = vector.broadcast %33 : vector<4x8x1xf32> to vector<4x8x16xf32>
    %35 = arith.subf %31, %34 : vector<4x8x16xf32>
    %36 = math.exp %35 : vector<4x8x16xf32>
    %cst_14 = arith.constant dense<0.000000e+00> : vector<4x8xf32>
    %37 = vector.multi_reduction <add>, %36, %cst_14 [2] : vector<4x8x16xf32> to vector<4x8xf32>
    %38 = vector.shape_cast %37 : vector<4x8xf32> to vector<4x8x1xf32>
    %39 = tpu.reciprocal %38 {approx = true} : vector<4x8x1xf32> -> vector<4x8x1xf32>
    %40 = vector.broadcast %39 : vector<4x8x1xf32> to vector<4x8x16xf32>
    %41 = arith.mulf %36, %40 : vector<4x8x16xf32>
    %42 = arith.truncf %41 : vector<4x8x16xf32> to vector<4x8x16xbf16>
    %c0_15 = arith.constant 0 : index
    %c0_16 = arith.constant 0 : index
    %c0_17 = arith.constant 0 : index
    %43 = vector.load %arg23[%c0_15, %c0_16, %c0_17] : memref<4x16x8xbf16, #tpu.memory_space<vmem>>, vector<4x16x8xbf16>
    "tpu.trace_start"() <{level = 10 : i32, message = "hqk,hkd->hqd"}> : () -> ()
    %cst_18 = arith.constant dense<0.000000e+00> : vector<4x8x8xf32>
    %44 = tpu.matmul %42, %43, %cst_18 {dimension_numbers = #tpu.dot_dimension_numbers<[2], [1], [1], [2], [0, 0, 0, 1, 1, 2], [0], [0]>} : vector<4x8x16xbf16>, vector<4x16x8xbf16>, vector<4x8x8xf32> -> vector<4x8x8xf32>
    "tpu.trace_stop"() : () -> ()
    %45 = tpu.transpose %44, [1, 0, 2] : vector<4x8x8xf32> -> vector<8x4x8xf32>
    %46 = vector.shape_cast %45 : vector<8x4x8xf32> to vector<8x32xf32>
    %47 = arith.truncf %46 : vector<8x32xf32> to vector<8x32xbf16>
    %c0_19 = arith.constant 0 : index
    %c0_20 = arith.constant 0 : index
    %48 = vector.load %arg11[%c0_19, %c0_20] : memref<32x32xbf16, #tpu.memory_space<vmem>>, vector<32x32xbf16>
    %cst_21 = arith.constant dense<0.000000e+00> : vector<8x32xf32>
    %49 = tpu.matmul %47, %48, %cst_21 {dimension_numbers = #tpu.dot_dimension_numbers<[1], [0], [0], [1], [0, 0, 1, 1], [], []>} : vector<8x32xbf16>, vector<32x32xbf16>, vector<8x32xf32> -> vector<8x32xf32>
    %c0_22 = arith.constant 0 : index
    %c0_23 = arith.constant 0 : index
    %50 = vector.load %arg12[%c0_22, %c0_23] : memref<1x32xf32, #tpu.memory_space<vmem>>, vector<1x32xf32>
    %51 = vector.broadcast %50 : vector<1x32xf32> to vector<8x32xf32>
    %52 = arith.addf %49, %51 : vector<8x32xf32>
    %53 = arith.addf %52, %13 : vector<8x32xf32>
    %cst_24 = arith.constant dense<0.000000e+00> : vector<8xf32>
    %54 = vector.multi_reduction <add>, %53, %cst_24 [1] : vector<8x32xf32> to vector<8xf32>
    %55 = vector.shape_cast %54 : vector<8xf32> to vector<8x1xf32>
    %cst_25 = arith.constant 3.200000e+01 : f32
    %56 = vector.broadcast %cst_25 : f32 to vector<8x1xf32>
    %57 = arith.divf %55, %56 : vector<8x1xf32>
    %58 = vector.broadcast %57 : vector<8x1xf32> to vector<8x32xf32>
    %59 = arith.subf %53, %58 : vector<8x32xf32>
    %60 = arith.mulf %59, %59 : vector<8x32xf32>
    %cst_26 = arith.constant dense<0.000000e+00> : vector<8xf32>
    %61 = vector.multi_reduction <add>, %60, %cst_26 [1] : vector<8x32xf32> to vector<8xf32>
    %62 = vector.shape_cast %61 : vector<8xf32> to vector<8x1xf32>
    %cst_27 = arith.constant 3.200000e+01 : f32
    %63 = vector.broadcast %cst_27 : f32 to vector<8x1xf32>
    %64 = arith.divf %62, %63 : vector<8x1xf32>
    %65 = vector.broadcast %57 : vector<8x1xf32> to vector<8x32xf32>
    %66 = arith.subf %53, %65 : vector<8x32xf32>
    %cst_28 = arith.constant 9.99999974E-6 : f32
    %67 = vector.broadcast %cst_28 : f32 to vector<8x1xf32>
    %68 = arith.addf %64, %67 : vector<8x1xf32>
    %69 = math.rsqrt %68 : vector<8x1xf32>
    %70 = vector.broadcast %69 : vector<8x1xf32> to vector<8x32xf32>
    %71 = arith.mulf %66, %70 : vector<8x32xf32>
    %c0_29 = arith.constant 0 : index
    %c0_30 = arith.constant 0 : index
    %72 = vector.load %arg13[%c0_29, %c0_30] : memref<1x32xf32, #tpu.memory_space<vmem>>, vector<1x32xf32>
    %73 = vector.broadcast %72 : vector<1x32xf32> to vector<8x32xf32>
    %74 = arith.mulf %71, %73 : vector<8x32xf32>
    %c0_31 = arith.constant 0 : index
    %c0_32 = arith.constant 0 : index
    %75 = vector.load %arg14[%c0_31, %c0_32] : memref<1x32xf32, #tpu.memory_space<vmem>>, vector<1x32xf32>
    %76 = vector.broadcast %75 : vector<1x32xf32> to vector<8x32xf32>
    %77 = arith.addf %74, %76 : vector<8x32xf32>
    %78 = arith.truncf %77 : vector<8x32xf32> to vector<8x32xbf16>
    %c0_33 = arith.constant 0 : index
    %c0_34 = arith.constant 0 : index
    %79 = vector.load %arg15[%c0_33, %c0_34] : memref<32x128xbf16, #tpu.memory_space<vmem>>, vector<32x128xbf16>
    %cst_35 = arith.constant dense<0.000000e+00> : vector<8x128xf32>
    %80 = tpu.matmul %78, %79, %cst_35 {dimension_numbers = #tpu.dot_dimension_numbers<[1], [0], [0], [1], [0, 0, 1, 1], [], []>} : vector<8x32xbf16>, vector<32x128xbf16>, vector<8x128xf32> -> vector<8x128xf32>
    %c0_36 = arith.constant 0 : index
    %c0_37 = arith.constant 0 : index
    %81 = vector.load %arg16[%c0_36, %c0_37] : memref<1x128xf32, #tpu.memory_space<vmem>>, vector<1x128xf32>
    %82 = vector.broadcast %81 : vector<1x128xf32> to vector<8x128xf32>
    %83 = arith.addf %80, %82 : vector<8x128xf32>
    %cst_38 = arith.constant 0.000000e+00 : f32
    %84 = vector.broadcast %cst_38 : f32 to vector<8x128xf32>
    %85 = arith.maximumf %83, %84 : vector<8x128xf32>
    %86 = arith.truncf %85 : vector<8x128xf32> to vector<8x128xbf16>
    %c0_39 = arith.constant 0 : index
    %c0_40 = arith.constant 0 : index
    %87 = vector.load %arg17[%c0_39, %c0_40] : memref<128x32xbf16, #tpu.memory_space<vmem>>, vector<128x32xbf16>
    %cst_41 = arith.constant dense<0.000000e+00> : vector<8x32xf32>
    %88 = tpu.matmul %86, %87, %cst_41 {dimension_numbers = #tpu.dot_dimension_numbers<[1], [0], [0], [1], [0, 0, 1, 1], [], []>} : vector<8x128xbf16>, vector<128x32xbf16>, vector<8x32xf32> -> vector<8x32xf32>
    %c0_42 = arith.constant 0 : index
    %c0_43 = arith.constant 0 : index
    %89 = vector.load %arg18[%c0_42, %c0_43] : memref<1x32xf32, #tpu.memory_space<vmem>>, vector<1x32xf32>
    %90 = vector.broadcast %89 : vector<1x32xf32> to vector<8x32xf32>
    %91 = arith.addf %88, %90 : vector<8x32xf32>
    %92 = arith.addf %91, %77 : vector<8x32xf32>
    %cst_44 = arith.constant dense<0.000000e+00> : vector<8xf32>
    %93 = vector.multi_reduction <add>, %92, %cst_44 [1] : vector<8x32xf32> to vector<8xf32>
    %94 = vector.shape_cast %93 : vector<8xf32> to vector<8x1xf32>
    %cst_45 = arith.constant 3.200000e+01 : f32
    %95 = vector.broadcast %cst_45 : f32 to vector<8x1xf32>
    %96 = arith.divf %94, %95 : vector<8x1xf32>
    %97 = vector.broadcast %96 : vector<8x1xf32> to vector<8x32xf32>
    %98 = arith.subf %92, %97 : vector<8x32xf32>
    %99 = arith.mulf %98, %98 : vector<8x32xf32>
    %cst_46 = arith.constant dense<0.000000e+00> : vector<8xf32>
    %100 = vector.multi_reduction <add>, %99, %cst_46 [1] : vector<8x32xf32> to vector<8xf32>
    %101 = vector.shape_cast %100 : vector<8xf32> to vector<8x1xf32>
    %cst_47 = arith.constant 3.200000e+01 : f32
    %102 = vector.broadcast %cst_47 : f32 to vector<8x1xf32>
    %103 = arith.divf %101, %102 : vector<8x1xf32>
    %104 = vector.broadcast %96 : vector<8x1xf32> to vector<8x32xf32>
    %105 = arith.subf %92, %104 : vector<8x32xf32>
    %cst_48 = arith.constant 9.99999974E-6 : f32
    %106 = vector.broadcast %cst_48 : f32 to vector<8x1xf32>
    %107 = arith.addf %103, %106 : vector<8x1xf32>
    %108 = math.rsqrt %107 : vector<8x1xf32>
    %109 = vector.broadcast %108 : vector<8x1xf32> to vector<8x32xf32>
    %110 = arith.mulf %105, %109 : vector<8x32xf32>
    %c0_49 = arith.constant 0 : index
    %c0_50 = arith.constant 0 : index
    %111 = vector.load %arg19[%c0_49, %c0_50] : memref<1x32xf32, #tpu.memory_space<vmem>>, vector<1x32xf32>
    %112 = vector.broadcast %111 : vector<1x32xf32> to vector<8x32xf32>
    %113 = arith.mulf %110, %112 : vector<8x32xf32>
    %c0_51 = arith.constant 0 : index
    %c0_52 = arith.constant 0 : index
    %114 = vector.load %arg20[%c0_51, %c0_52] : memref<1x32xf32, #tpu.memory_space<vmem>>, vector<1x32xf32>
    %115 = vector.broadcast %114 : vector<1x32xf32> to vector<8x32xf32>
    %116 = arith.addf %113, %115 : vector<8x32xf32>
    %c0_53 = arith.constant 0 : index
    %c0_54 = arith.constant 0 : index
    %c0_55 = arith.constant 0 : index
    %117 = vector.load %arg21[%c0_53, %c0_54, %c0_55] : memref<1x8x32xf32, #tpu.memory_space<vmem>>, vector<1x8x32xf32>
    %118 = vector.shape_cast %117 : vector<1x8x32xf32> to vector<8x32xf32>
    %119 = vector.shape_cast %116 : vector<8x32xf32> to vector<1x8x32xf32>
    tpu.vector_store %arg21[%c0_53, %c0_54, %c0_55], %119 {strides = array<i32>} : memref<1x8x32xf32, #tpu.memory_space<vmem>>, vector<1x8x32xf32>,
    return
  }
  func.func @transform_0(%arg0: i32, %arg1: i32, %arg2: i32) -> (i32, i32, i32) {
    %c0_i32 = arith.constant 0 : i32
    %c0_i32_0 = arith.constant 0 : i32
    %c0_i32_1 = arith.constant 0 : i32
    return %arg0, %c0_i32, %c0_i32_0 : i32, i32, i32
  }
  func.func @transform_1(%arg0: i32, %arg1: i32, %arg2: i32) -> (i32, i32, i32) {
    %c0_i32 = arith.constant 0 : i32
    %c0_i32_0 = arith.constant 0 : i32
    %c0_i32_1 = arith.constant 0 : i32
    return %arg0, %c0_i32, %c0_i32_0 : i32, i32, i32
  }
  func.func @transform_2(%arg0: i32, %arg1: i32, %arg2: i32) -> (i32, i32) {
    %c0_i32 = arith.constant 0 : i32
    %c0_i32_0 = arith.constant 0 : i32
    %c0_i32_1 = arith.constant 0 : i32
    return %c0_i32, %c0_i32_0 : i32, i32
  }
  func.func @transform_3(%arg0: i32, %arg1: i32, %arg2: i32) -> (i32, i32) {
    %c0_i32 = arith.constant 0 : i32
    %c0_i32_0 = arith.constant 0 : i32
    %c0_i32_1 = arith.constant 0 : i32
    return %c0_i32, %c0_i32_0 : i32, i32
  }
  func.func @transform_4(%arg0: i32, %arg1: i32, %arg2: i32) -> (i32, i32) {
    %c0_i32 = arith.constant 0 : i32
    %c0_i32_0 = arith.constant 0 : i32
    %c0_i32_1 = arith.constant 0 : i32
    return %c0_i32, %c0_i32_0 : i32, i32
  }
  func.func @transform_5(%arg0: i32, %arg1: i32, %arg2: i32) -> (i32, i32) {
    %c0_i32 = arith.constant 0 : i32
    %c0_i32_0 = arith.constant 0 : i32
    %c0_i32_1 = arith.constant 0 : i32
    return %c0_i32, %c0_i32_0 : i32, i32
  }
  func.func @transform_6(%arg0: i32, %arg1: i32, %arg2: i32) -> (i32, i32) {
    %c0_i32 = arith.constant 0 : i32
    %c0_i32_0 = arith.constant 0 : i32
    %c0_i32_1 = arith.constant 0 : i32
    return %c0_i32, %c0_i32_0 : i32, i32
  }
  func.func @transform_7(%arg0: i32, %arg1: i32, %arg2: i32) -> (i32, i32) {
    %c0_i32 = arith.constant 0 : i32
    %c0_i32_0 = arith.constant 0 : i32
    %c0_i32_1 = arith.constant 0 : i32
    return %c0_i32, %c0_i32_0 : i32, i32
  }
  func.func @transform_8(%arg0: i32, %arg1: i32, %arg2: i32) -> (i32, i32) {
    %c0_i32 = arith.constant 0 : i32
    %c0_i32_0 = arith.constant 0 : i32
    %c0_i32_1 = arith.constant 0 : i32
    return %c0_i32, %c0_i32_0 : i32, i32
  }
  func.func @transform_9(%arg0: i32, %arg1: i32, %arg2: i32) -> (i32, i32) {
    %c0_i32 = arith.constant 0 : i32
    %c0_i32_0 = arith.constant 0 : i32
    %c0_i32_1 = arith.constant 0 : i32
    return %c0_i32, %c0_i32_0 : i32, i32
  }
  func.func @transform_10(%arg0: i32, %arg1: i32, %arg2: i32) -> (i32, i32) {
    %c0_i32 = arith.constant 0 : i32
    %c0_i32_0 = arith.constant 0 : i32
    %c0_i32_1 = arith.constant 0 : i32
    return %c0_i32, %c0_i32_0 : i32, i32
  }
  func.func @transform_11(%arg0: i32, %arg1: i32, %arg2: i32) -> (i32, i32) {
    %c0_i32 = arith.constant 0 : i32
    %c0_i32_0 = arith.constant 0 : i32
    %c0_i32_1 = arith.constant 0 : i32
    return %c0_i32, %c0_i32_0 : i32, i32
  }
  func.func @transform_12(%arg0: i32, %arg1: i32, %arg2: i32) -> (i32, i32) {
    %c0_i32 = arith.constant 0 : i32
    %c0_i32_0 = arith.constant 0 : i32
    %c0_i32_1 = arith.constant 0 : i32
    return %c0_i32, %c0_i32_0 : i32, i32
  }
  func.func @transform_13(%arg0: i32, %arg1: i32, %arg2: i32) -> (i32, i32) {
    %c0_i32 = arith.constant 0 : i32
    %c0_i32_0 = arith.constant 0 : i32
    %c0_i32_1 = arith.constant 0 : i32
    return %c0_i32, %c0_i32_0 : i32, i32
  }
  func.func @transform_14(%arg0: i32, %arg1: i32, %arg2: i32) -> (i32, i32) {
    %c0_i32 = arith.constant 0 : i32
    %c0_i32_0 = arith.constant 0 : i32
    %c0_i32_1 = arith.constant 0 : i32
    return %c0_i32, %c0_i32_0 : i32, i32
  }
  func.func @transform_15(%arg0: i32, %arg1: i32, %arg2: i32) -> (i32, i32) {
    %c0_i32 = arith.constant 0 : i32
    %c0_i32_0 = arith.constant 0 : i32
    %c0_i32_1 = arith.constant 0 : i32
    return %c0_i32, %c0_i32_0 : i32, i32
  }
  func.func @transform_16(%arg0: i32, %arg1: i32, %arg2: i32) -> (i32, i32) {
    %c0_i32 = arith.constant 0 : i32
    %c0_i32_0 = arith.constant 0 : i32
    %c0_i32_1 = arith.constant 0 : i32
    return %c0_i32, %c0_i32_0 : i32, i32
  }
  func.func @transform_17(%arg0: i32, %arg1: i32, %arg2: i32) -> (i32, i32) {
    %c0_i32 = arith.constant 0 : i32
    %c0_i32_0 = arith.constant 0 : i32
    %c0_i32_1 = arith.constant 0 : i32
    return %c0_i32, %c0_i32_0 : i32, i32
  }
  func.func @transform_18(%arg0: i32, %arg1: i32, %arg2: i32) -> (i32, i32, i32) {
    %c1_i32 = arith.constant 1 : i32
    %0 = arith.muli %arg1, %c1_i32 : i32
    %1 = arith.addi %0, %arg2 : i32
    %c0_i32 = arith.constant 0 : i32
    %c0_i32_0 = arith.constant 0 : i32
    return %arg0, %1, %c0_i32 : i32, i32, i32
  }
}

</mosaic_0001>

<bundles_post_ra>
// kernel: tpu_custom_call.1
= control target key start
LH: loop header
LB: loop body
LE: loop exit
PB: predicated region body
PF: predicated region fallthrough
CT: control target
= control target key end

     0   :  { %s3748_s0 = inlined_call_operand.vmem [shape: f32[2,16,32], index: 0, kind: input, shape index: {}]   ;;  %s3749_s1 = inlined_call_operand.vmem [shape: f32[2,16,32], index: 1, kind: input, shape index: {}]   ;;  %s3750_s2 = inlined_call_operand.vmem [shape: bf16[32,32], index: 2, kind: input, shape index: {}]   ;;  %s3751_s3 = inlined_call_operand.vmem [shape: f32[1,32], index: 3, kind: input, shape index: {}]   ;;  %s3752_s4 = inlined_call_operand.hbm [shape: bf16[32,32], index: 4, kind: input, shape index: {}]   ;;  %s3753_s5 = inlined_call_operand.vmem [shape: f32[1,32], index: 5, kind: input, shape index: {}]   ;;  %s3754_s6 = inlined_call_operand.hbm [shape: bf16[32,32], index: 6, kind: input, shape index: {}]   ;;  %s3755_s7 = inlined_call_operand.hbm [shape: f32[1,32], index: 7, kind: input, shape index: {}]   ;;  %s3756_s8 = inlined_call_operand.hbm [shape: bf16[32,32], index: 8, kind: input, shape index: {}]   ;;  %s3757_s9 = inlined_call_operand.hbm [shape: f32[1,32], index: 9, kind: input, shape index: {}]   ;;  %s3758_s10 = inlined_call_operand.vmem [shape: f32[1,32], index: 10, kind: input, shape index: {}]   ;;  %s3759_s11 = inlined_call_operand.vmem [shape: f32[1,32], index: 11, kind: input, shape index: {}]   ;;  %s3760_s12 = inlined_call_operand.vmem [shape: bf16[32,128], index: 12, kind: input, shape index: {}]   ;;  %s3761_s13 = inlined_call_operand.vmem [shape: f32[1,128], index: 13, kind: input, shape index: {}]   ;;  %s3762_s14 = inlined_call_operand.vmem [shape: bf16[128,32], index: 14, kind: input, shape index: {}]   ;;  %s3763_s15 = inlined_call_operand.vmem [shape: f32[1,32], index: 15, kind: input, shape index: {}]   ;;  %s3764_s16 = inlined_call_operand.vmem [shape: f32[1,32], index: 16, kind: input, shape index: {}]   ;;  %s3765_s17 = inlined_call_operand.vmem [shape: f32[1,32], index: 17, kind: input, shape index: {}]   ;;  %s3766_s18 = inlined_call_operand.hbm [shape: f32[2,16,32], index: 18, kind: output, shape index: {}]  }
   0x1   :  { %3785 = sst [smem:[#allocation29_spill]] %s3748_s0 }
   0x2   :  { %3786 = sst [smem:[#allocation30_spill]] %s3749_s1 }
   0x3   :  { %3787 = sst [smem:[#allocation31_spill]] %s3750_s2 }
   0x4   :  { %3788 = sst [smem:[#allocation32_spill]] %s3754_s6 }
   0x5   :  { %3789 = sst [smem:[#allocation33_spill]] %s3761_s13 }
   0x6   :  { %3790 = sst [smem:[#allocation34_spill]] %s3763_s15 }
   0x7   :  { %3791 = sst [smem:[#allocation35_spill]] %s3764_s16 }
   0x8   :  { %3792 = sst [smem:[#allocation36_spill]] %s3765_s17 }
   0x9   :  { %3793 = sst [smem:[#allocation37_spill]] %s3766_s18 }
   0xa   :  { %23 = vsyncpa [#allocation5], 0 }
   0xb   :  { %24 = vsyncpa [#allocation8], 0 }
   0xc   :  { %25 = vsyncpa [#allocation11], 0 }
   0xd   :  { %26 = vsyncpa [#allocation6], 0 }
   0xe   :  { %28 = vsyncpa [#allocation6 + $0x1], 0  ;;  %s3202_s27 = smov 0   ;;  %s3204_s28 = smov 0  }
   0xf   :  { %s3206_s29 = smov 0   ;;  %s3208_s30 = smov 0  }
  0x10   :  { %s3210_s0 = smov 0   ;;  %s3212_s19 = smov 0  }
  0x11   :  { %s3214_s1 = smov 0   ;;  %s3216_s20 = smov 0  }
  0x12 LB: > { %3794 = sst [smem:[#allocation18_spill]] %s3059_s27  ;;  %s2444_s21 = sadd.s32 4294967295, %s3087_s20   ;;  %s3087_s20 = sphi %s3216_s20, %s34_s20   ;;  %s3083_s1 = sphi %s3214_s1, %s3836_s1   ;;  %s3079_s19 = sphi %s3212_s19, %s3835_s19   ;;  %s3075_s0 = sphi %s3210_s0, %s3834_s0   ;;  %s3071_s30 = sphi %s3208_s30, %s3833_s30   ;;  %s3067_s29 = sphi %s3206_s29, %s3832_s29   ;;  %s3063_s28 = sphi %s3204_s28, %s3831_s28   ;;  %s3059_s27 = sphi %s3202_s27, %s3830_s27  }
  0x13   : > { %3795 = sst [smem:[#allocation19_spill]] %s3063_s28  ;;  %s2445_s22 = sadd.s32 4294967294, %s3087_s20  }
  0x14   : > { %3796 = sst [smem:[#allocation20_spill]] %s3067_s29  ;;  %s49_s2 = sadd.s32 1, %s3079_s19 }
  0x15   : > { %3797 = sst [smem:[#allocation21_spill]] %s3079_s19  ;;  %s53_s23 = sadd.s32 1, %s3083_s1 }
  0x16   : > { %3798 = sst [smem:[#allocation22_spill]] %s3083_s1  ;;  %p51_p0 = scmp.ge.s32.totalorder %s49_s2, 2 }
  0x17   : > { %3799 = sst [smem:[#allocation23_spill]] %s3087_s20  ;;  %s452_s24 = sadd.s32 1, %s3067_s29 }
  0x18   : > { %p462_p1 = scmp.ne.s32.totalorder %s3067_s29, %s3063_s28  ;;  %p463_p2 = scmp.eq.s32.totalorder %s2444_s21, 3 }
  0x19   : > { %s3838_s2 = smov (%p51_p0, %s49_s2), 0  ;;  %s3840_s23 = smov (!%p51_p0, %s53_s23), %s3083_s1 }
  0x1a   : > { %3800 = sst [smem:[#allocation24_spill]] %s3838_s2  ;;  %s448_s25 = ssub.s32 %s3079_s19, %s3838_s2 }
  0x1b   : > { %p3254_p3 = por %p463_p2, %p462_p1  ;;  %p55_p4 = scmp.ge.s32.totalorder %s3840_s23, 2 }
  0x1c   : > { %p468_p5 = scmp.ne.s32.totalorder %s3063_s28, %s3059_s27  ;;  %p469_p6 = scmp.eq.s32.totalorder %s2445_s22, 3 }
  0x1d   : > { %s3801_s26 = scalar_select %p3254_p3, 1, 0 }
  0x1e   : > { %p2446_p7 = scmp.ge.s32.totalorder %s3087_s20, 1  ;;  %s3842_s23 = smov (%p55_p4, %s3840_s23), 0 }
  0x1f   : > { %3802 = sst [smem:[#allocation25_spill]] %s3801_s26  ;;  %p3263_p8 = por %p469_p6, %p468_p5 }
  0x20   : > { %3803 = sst [smem:[#allocation26_spill]] %s3842_s23  ;;  %p476_p9 = scmp.lt.s32.totalorder %s3087_s20, 5 }
  0x21   : > { %s3804_s18 = scalar_select %p3263_p8, 1, 0 }
  0x22   : > { %s447_s17 = ssub.s32 %s3083_s1, %s3842_s23  ;;  %p3270_p10 = pnand %p2446_p7, %p476_p9 }
  0x23   : > { %3805 = sst [smem:[#allocation27_spill]] %s3804_s18  ;;  %s449_s16 = sor.u32 %s448_s25, %s447_s17 }
  0x24   : > { %s3806_s2 = scalar_select %p3270_p10, 1, 0 }
  0x25   : > { %p450_p11 = scmp.eq.s32.totalorder %s449_s16, 0  ;;  %p3274_p12 = scmp.eq.s32.totalorder %s2444_s21, 0 }
  0x26   : > { %p2691_p13 = pneg %p3270_p10  ;;  %s3089_s17 = smov [#allocation7]  }
  0x27   : > { %s3807_s19 = scalar_select %p3274_p12, 1, 0 }
  0x28   : > { %s3281_s22 = scalar_select %p450_p11, %s3067_s29, %s452_s24  }
  0x29   : > { %p3285_p0 = pnand %p3274_p12, %p2691_p13  ;;  %s510_s25 = sshll.u32 %s3089_s17, 4  ;;  %s511_s25 = int_to_ptr.vmem [resolvable:$true] %s510_s25 }
  0x2a   : > { %3808 = sst [smem:[#allocation28_spill]] %s3281_s22  ;;  %s3090_s23 = smov [#allocation10]  }
  0x2b   : > { %s534_s16 = sshll.u32 %s3090_s23, 4  ;;  %s3810_s6 = sld [smem:[#allocation32_spill]]  ;;  %s535_s16 = int_to_ptr.vmem [resolvable:$true] %s534_s16 }
  0x2c   : > { %p3297_p2 = pneg %p3285_p0 }
  0x31   : > { %s2841_s27 = scalar_lea.hbm %s3810_s6, 256 }
  0x32   : > { %p2842_p1 = scmp.ne.s32.totalorder %s3810_s6, %s2841_s27  ;;  %p2848_p6 = scmp.lt.u32.totalorder %s2841_s27, %s3810_s6 }
  0x34   : > { %p2844_p4 = pnand %p3297_p2, %p2842_p1 }
  0x36   : > { %p2845_p5 = pneg %p2844_p4 }
  0x38   : > { %p2850_p7 = pnand %p2848_p6, %p2845_p5 }
  0x3a   : > { %2853 = shalt.err (!%p2850_p7)
}
  0x3b   : > { %s2854_s1 = scalar_lea.vmem %s511_s25, 256  ;;  %p2862_p8 = scmp.lt.s32.totalorder %s511_s25, %s511_s25 }
  0x3c   : > { %p2855_p9 = scmp.ne.s32.totalorder %s511_s25, %s2854_s1  ;;  %p2863_p3 = scmp.lt.s32.totalorder %s2854_s1, %s2854_s1 }
  0x3e   : > { %p2857_p11 = pnand %p2855_p9, %p3297_p2  ;;  %p2864_p12 = por %p2863_p3, %p2862_p8 }
  0x40   : > { %p2858_p13 = pneg %p2857_p11 }
  0x42   : > { %p2865_p10 = pnand %p2864_p12, %p2858_p13 }
  0x44   : > { %2868 = shalt.err (!%p2865_p10)
}
  0x45   : > { %s3091_s20 = smov 64   ;;  %s3092_s23 = smov 4  }
  0x46   : > { %2697 = dma.hbm_to_vmem [thread:$0]  (!%p3285_p0), %s3810_s6, 256, %s511_s25, [#allocation8], %s3091_s20, %s3091_s20, %s3092_s23  }
  0x47   : > { %s2869_s17 = scalar_lea.hbm %s3756_s8, 256 }
  0x48   : > { %p2870_p3 = scmp.ne.s32.totalorder %s3756_s8, %s2869_s17  ;;  %p2876_p12 = scmp.lt.u32.totalorder %s2869_s17, %s3756_s8 }
  0x4a   : > { %p2872_p8 = pnand %p2870_p3, %p3297_p2 }
  0x4c   : > { %p2873_p10 = pneg %p2872_p8 }
  0x4e   : > { %p2878_p1 = pnand %p2876_p12, %p2873_p10 }
  0x50   : > { %2881 = shalt.err (!%p2878_p1)
}
  0x51   : > { %s2882_s27 = scalar_lea.vmem %s535_s16, 256  ;;  %p2890_p7 = scmp.lt.s32.totalorder %s535_s16, %s535_s16 }
  0x52   : > { %p2883_p4 = scmp.ne.s32.totalorder %s535_s16, %s2882_s27  ;;  %p2891_p9 = scmp.lt.s32.totalorder %s2882_s27, %s2882_s27 }
  0x54   : > { %p2885_p5 = pnand %p2883_p4, %p3297_p2  ;;  %p2892_p11 = por %p2891_p9, %p2890_p7 }
  0x56   : > { %p2886_p6 = pneg %p2885_p5 }
  0x58   : > { %p2893_p13 = pnand %p2892_p11, %p2886_p6 }
  0x5a   : > { %2896 = shalt.err (!%p2893_p13)
}
  0x5b   : > { %2703 = dma.hbm_to_vmem [thread:$0]  (!%p3285_p0), %s3756_s8, 256, %s535_s16, [#allocation11], %s3091_s20, %s3091_s20, %s3092_s23  }
  0x5c   : > { %s3093_s29 = smov [#allocation4]   ;;  %s3094_s26 = smov [#allocation9]  }
  0x5d   : > { %s494_s25 = sshll.u32 %s3093_s29, 4  ;;  %s524_s22 = sshll.u32 %s3094_s26, 4  ;;  %s495_s25 = int_to_ptr.vmem [resolvable:$true] %s494_s25  ;;  %s525_s22 = int_to_ptr.vmem [resolvable:$true] %s524_s22 }
  0x5e   : > { %s2897_s1 = scalar_lea.hbm %s3752_s4, 256 }
  0x5f   : > { %p2898_p3 = scmp.ne.s32.totalorder %s3752_s4, %s2897_s1  ;;  %p2904_p12 = scmp.lt.u32.totalorder %s2897_s1, %s3752_s4 }
  0x61   : > { %p2900_p8 = pnand %p2898_p3, %p3297_p2 }
  0x63   : > { %p2901_p10 = pneg %p2900_p8 }
  0x65   : > { %p2906_p1 = pnand %p2904_p12, %p2901_p10 }
  0x67   : > { %2909 = shalt.err (!%p2906_p1)
}
  0x68   : > { %s2910_s16 = scalar_lea.vmem %s495_s25, 256  ;;  %p2918_p7 = scmp.lt.s32.totalorder %s495_s25, %s495_s25 }
  0x69   : > { %p2911_p4 = scmp.ne.s32.totalorder %s495_s25, %s2910_s16  ;;  %p2919_p9 = scmp.lt.s32.totalorder %s2910_s16, %s2910_s16 }
  0x6b   : > { %p2913_p5 = pnand %p2911_p4, %p3297_p2  ;;  %p2920_p11 = por %p2919_p9, %p2918_p7 }
  0x6d   : > { %p2914_p6 = pneg %p2913_p5 }
  0x6f   : > { %p2921_p13 = pnand %p2920_p11, %p2914_p6 }
  0x71   : > { %2924 = shalt.err (!%p2921_p13)
}
  0x72   : > { %2694 = dma.hbm_to_vmem [thread:$0]  (!%p3285_p0), %s3752_s4, 256, %s495_s25, [#allocation5], %s3091_s20, %s3091_s20, %s3092_s23  }
  0x73   : > { %s2925_s26 = scalar_lea.hbm %s3755_s7, 16 }
  0x74   : > { %p2926_p3 = scmp.ne.s32.totalorder %s3755_s7, %s2925_s26  ;;  %p2932_p12 = scmp.lt.u32.totalorder %s2925_s26, %s3755_s7 }
  0x76   : > { %p2928_p8 = pnand %p2926_p3, %p3297_p2 }
  0x78   : > { %p2929_p10 = pneg %p2928_p8 }
  0x7a   : > { %p2934_p1 = pnand %p2932_p12, %p2929_p10 }
  0x7c   : > { %2937 = shalt.err (!%p2934_p1)
}
  0x7d   : > { %s2938_s15 = scalar_lea.vmem %s525_s22, 16  ;;  %s2945_s20 = scalar_lea.vmem %s525_s22, 32 }
  0x7e   : > { %p2939_p4 = scmp.ne.s32.totalorder %s525_s22, %s2938_s15  ;;  %p2946_p7 = scmp.lt.s32.totalorder %s525_s22, %s525_s22 }
  0x7f   : > { %p2947_p9 = scmp.lt.s32.totalorder %s2945_s20, %s2938_s15 }
  0x80   : > { %p2941_p5 = pnand %p2939_p4, %p3297_p2 }
  0x81   : > { %p2948_p11 = por %p2947_p9, %p2946_p7 }
  0x82   : > { %p2942_p6 = pneg %p2941_p5 }
  0x84   : > { %p2949_p13 = pnand %p2948_p11, %p2942_p6 }
  0x86   : > { %2952 = shalt.err (!%p2949_p13)
}
  0x87   : > { %2700 = dma.hbm_to_vmem [thread:$0]  (!%p3285_p0), %s3755_s7, 16, %s525_s22, [#allocation8]  }
  0x88   : > { %s3095_s16 = smov [#allocation12]   ;;  %s2953_s29 = scalar_lea.hbm %s3757_s9, 16 }
  0x89   : > { %s548_s6 = sshll.u32 %s3095_s16, 4  ;;  %p2954_p3 = scmp.ne.s32.totalorder %s3757_s9, %s2953_s29  ;;  %s549_s6 = int_to_ptr.vmem [resolvable:$true] %s548_s6 }
  0x8a   : > { %p2960_p12 = scmp.lt.u32.totalorder %s2953_s29, %s3757_s9 }
  0x8b   : > { %p2956_p8 = pnand %p2954_p3, %p3297_p2 }
  0x8d   : > { %p2957_p10 = pneg %p2956_p8 }
  0x8f   : > { %p2962_p1 = pnand %p2960_p12, %p2957_p10 }
  0x91   : > { %2965 = shalt.err (!%p2962_p1)
}
  0x92   : > { %s2966_s22 = scalar_lea.vmem %s549_s6, 16  ;;  %s2973_s27 = scalar_lea.vmem %s549_s6, 32 }
  0x93   : > { %p2967_p4 = scmp.ne.s32.totalorder %s549_s6, %s2966_s22  ;;  %p2974_p7 = scmp.lt.s32.totalorder %s549_s6, %s549_s6 }
  0x94   : > { %p2975_p9 = scmp.lt.s32.totalorder %s2973_s27, %s2966_s22 }
  0x95   : > { %p2969_p5 = pnand %p2967_p4, %p3297_p2 }
  0x96   : > { %p2976_p11 = por %p2975_p9, %p2974_p7 }
  0x97   : > { %p2970_p6 = pneg %p2969_p5 }
  0x99   : > { %p2977_p13 = pnand %p2976_p11, %p2970_p6 }
  0x9b   : > { %2980 = shalt.err (!%p2977_p13)
}
  0x9c   : > { %2706 = dma.hbm_to_vmem [thread:$0]  (!%p3285_p0), %s3757_s9, 16, %s549_s6, [#allocation11]  }
  0x9d   : > { %p3812_p3 = scmp.ne.s32.totalorder %s3806_s2, 0 }
  0x9e   : > { %p3813_p8 = scmp.ne.s32.totalorder (!%p3812_p3), %s3807_s19, 0 }
  0x9f   : > { %601 = sbr.rel (%p3812_p3) target bundleno = 2783 (0xadf), region = 92 }
  0xa6   : > { %3042 = dma.done.wait (%p3813_p8), [#allocation5], 256  }
  0xa7   : > { %3044 = vsyncadd (%p3813_p8), [#allocation5], 4294967040 }
  0xa8   : > { %3046 = dma.done.wait (%p3813_p8), [#allocation8], 272  }
  0xa9   : > { %3048 = vsyncadd (%p3813_p8), [#allocation8], 4294967024 }
  0xaa   : > { %3050 = dma.done.wait (%p3813_p8), [#allocation11], 272  }
  0xab   : > { %3052 = vsyncadd (%p3813_p8), [#allocation11], 4294967024  ;;  %p676_p0 = scmp.lt.s32.totalorder %s3075_s0, 1  ;;  %v3096_v0 = vmov 0.0   ;;  %vm3097_vm0 = vmmov 0   ;;  %s3814_s23 = sld [smem:[#allocation29_spill]]  ;;  %v897_v41 = vlaneseq }
  0xac   : > { %2561 = vmatprep.subr.bf16.mxu0 %v3096_v0  ;;  %2565 = vmatprep.mubr.msk.bf16.mxu0 %vm3097_vm0, %v3096_v0  ;;  %s3815_s13 = sld [smem:[#allocation30_spill]]  ;;  %v2803_v1 = vld [vmem:[#allocation4] sm:$0xff]   ;;  %v2804_v2 = vld [vmem:[#allocation4 + $0x8] sm:$0xff]   ;;  %vm722_vm1 = vcmask 261120   ;;  %s2476_s29 = sshll.u32 %s3071_s30, 3  ;;  %v2805_v10 = vld [vmem:[#allocation7] sm:$0xff]  }
  0xad   : > { %s677_s18 = scalar_select %p676_p0, %s3075_s0, 1  ;;  %2585 = vmatprep.subr.bf16.mxu1 %v3096_v0  ;;  %2587 = vmatprep.mubr.msk.bf16.mxu1 %vm3097_vm0, %v3096_v0  ;;  %v2806_v11 = vld [vmem:[#allocation7 + $0x8] sm:$0xff]   ;;  %v2468_v24 = vld [vmem:[#allocation9] ss:$0 sm:$0xff]  ;;  %v2477_v28 = vld [vmem:[%s3751_s3] ss:$0 sm:$0xff] }
  0xae   : > { %2562 = vmatpush3.bf16.msra.mxu0 %v2803_v1  ;;  %s3816_s22 = sld [smem:[#allocation31_spill]]  ;;  %s3099_s24 = smov 120   ;;  %v2464_v34 = vld [vmem:[%s3753_s5] ss:$0 sm:$0xff]  ;;  %v3101_v39 = vmov 1983009808  }
  0xaf   : > { %s2519_s2 = sshll.u32 %s677_s18, 4  ;;  %2563 = vmatprep.subr.bf16.mxu0 %v3096_v0  ;;  %s3100_s19 = smov 112   ;;  %v895_v40 = vunpack.c.l.s4 %v3101_v39  ;;  %v898_v44 = vshrl.u32 %v897_v41, 7  ;;  %v3102_v46 = vmov 1934713408   ;;  %vm867_vm2 = vcmask 125952  }
  0xb0   : > { %v927_v47 = vunpack.c.l.s4 %v3102_v46  ;;  %vm1406_vm3 = vcmask 1043456   ;;  %vm1168_vm4 = vcmask 64512   ;;  %vm1597_vm6 = vcmask 130048   ;;  %s3103_s16 = smov 16   ;;  %s3104_s6 = smov 8  }
  0xb1   : > { %s680_s25 = scalar_lea.vmem %s3814_s23, %s2519_s2  ;;  %v896_v43 = vunpack.c.0.s8 %v895_v40  ;;  %vm1972_vm7 = vcmask 195584   ;;  %s3817_s20 = sld [smem:[#allocation33_spill]] }
  0xb2   : > { %s685_s28 = scalar_lea.vmem %s3815_s13, %s2519_s2  ;;  %v692_v3 = vld [vmem:[%s680_s25] sm:$0xff]  ;;  %v693_v4 = vld [vmem:[%s680_s25 + $0x8] sm:$0xff]  ;;  %2564 = vmatpush3.bf16.msra.mxu0 %v2804_v2  ;;  %s1175_s26 = scalar_lea.vmem %s680_s25, %s2476_s29  ;;  %v928_v53 = vunpack.c.0.s8 %v927_v47 }
  0xb3   : > { %v694_v5 = vld [vmem:[%s685_s28] sm:$0xff]  ;;  %v695_v6 = vld [vmem:[%s685_s28 + $0x8] sm:$0xff]  ;;  %2569 = vmatprep.subr.bf16.mxu0 %v3096_v0  ;;  %s1177_s21 = scalar_lea.vmem %s685_s28, %s2476_s29  ;;  %s3098_s2 = smov 104   ;;  %v3464_v50 = vsub.s32 %v896_v43, %v898_v44 }
  0xb4   : > { %v696_v7 = vadd.f32 %v694_v5, %v692_v3  ;;  %v697_v8 = vadd.f32 %v695_v6, %v693_v4  ;;  %v2807_v12 = vld [vmem:[%s3816_s22] sm:$0xff]   ;;  %v2808_v16 = vld [vmem:[%s3816_s22 + $0x8] sm:$0xff]   ;;  %v3470_v58 = vsub.s32 %v928_v53, %v898_v44  ;;  %s3105_s13 = smov 24   ;;  %s3822_s1 = sld [smem:[#allocation36_spill]] }
  0xb5   : > { %v1176_v13 = vld [vmem:[%s1175_s26] sm:$0xff]  ;;  %s3821_s26 = sld [smem:[#allocation35_spill]] }
  0xb6   : > { %v698_v9 = vpack.c.bf16 %v697_v8, %v696_v7  ;;  %v1178_v14 = vld [vmem:[%s1177_s21] sm:$0xff] }
  0xb7   : > { %v3434_v15 = vadd.f32 %v1178_v14, %v1176_v13 }
  0xb8   : > { %2566 = vmatmul.mubr.msk.bf16.vlgmr.msra.gmra.mrb[0].mxu0 %vm722_vm1, %v698_v9 }
  0xb9   : > { %2570 = vmatpush3.bf16.msra.mxu0 %v2805_v10  ;;  %2573 = vmatprep.mubr.msk.bf16.mxu0 %vm3097_vm0, %v3096_v0  ;;  %v1180_v17 = vpack.c.bf16 %v3434_v15, %v3434_v15 }
  0xba   : > { %2571 = vmatprep.subr.bf16.mxu0 %v3096_v0 }
  0xbd   : > { %2572 = vmatpush3.bf16.msra.mxu0 %v2806_v11 }
  0xbe   : > { %2577 = vmatprep.subr.bf16.mxu0 %v3096_v0 }
  0xc0   : > { %2574 = vmatmul.mubr.msk.bf16.vlgmr.msra.gmra.mrb[4].mxu0 %vm722_vm1, %v698_v9 }
  0xc1   : > { %2578 = vmatpush3.bf16.msra.mxu0 %v2807_v12  ;;  %2581 = vmatprep.mubr.msk.bf16.mxu0 %vm3097_vm0, %v3096_v0 }
  0xc2   : > { %2579 = vmatprep.subr.bf16.mxu0 %v3096_v0 }
  0xc5   : > { %2580 = vmatpush3.bf16.msra.mxu0 %v2808_v16 }
  0xc6   : > { %2591 = vmatprep.subr.bf16.mxu0 %v3096_v0 }
  0xc8   : > { %2582 = vmatmul.mubr.msk.bf16.vlgmr.msra.gmra.mrb[8].mxu0 %vm722_vm1, %v1180_v17 }
  0xc9   : > { %2593 = vmatprep.mubr.msk.bf16.mxu0 %vm3097_vm0, %v3096_v0 }
 0x18b   : > { %v760_v18 = vpop.f32.mrb[0].mxu0 }
 0x18c   : > { %v2567_v19 = vpop.f32.mrb[1].mxu0  ;;  %v761_v35 = vadd.f32 %v2464_v34, %v760_v18 }
 0x18d   : > { %v763_v20 = vpop.f32.mrb[2].mxu0 }
 0x18e   : > { %v2568_v21 = vpop.f32.mrb[3].mxu0  ;;  %v764_v36 = vadd.f32 %v2464_v34, %v763_v20 }
 0x193   : > { %v824_v22 = vpop.f32.mrb[4].mxu0 }
 0x194   : > { %v2575_v23 = vpop.f32.mrb[5].mxu0  ;;  %v3459_v37 = vadd.f32 %v2468_v24, %v824_v22 }
 0x195   : > { %v827_v25 = vpop.f32.mrb[6].mxu0 }
 0x196   : > { %v3448_v26 = vadd.f32 %v2468_v24, %v827_v25  ;;  %v2576_v27 = vpop.f32.mrb[7].mxu0 }
 0x19b   : > { %v1242_v29 = vpop.f32.mrb[8].mxu0 }
 0x19c   : > { %v1243_v30 = vadd.f32 %v2477_v28, %v1242_v29  ;;  %v2583_v31 = vpop.f32.mrb[9].mxu0 }
 0x19d   : > { %v1245_v32 = vpop.f32.mrb[10].mxu0 }
 0x19e   : > { %1255 = vrot.lane.b32.xlu1 %v1243_v30, %s3098_s2  ;;  %1249 = vrot.lane.b32.xlu0 %v1243_v30, %s3099_s24  ;;  %v2584_v33 = vpop.f32.mrb[11].mxu0 }
 0x1a2   : > { %1252 = vrot.lane.b32.xlu0 %v1243_v30, %s3100_s19 }
 0x1c7   : > { %831 = vxpose.xlu1.b32.start [1/2] (short) (narrow) %v761_v35, 32 }
 0x1cb   : > { %832 = vxpose.xlu1.b32.end [2/2] (short) (narrow) %v764_v36, 32 }
 0x1f1   : > { %874 = vrot.lane.b32.xlu1 %v3459_v37, %s3099_s24 }
 0x210   : > { %v1250_v38 = vpop.permute.xlu0 %1249  ;;  %v1256_v45 = vpop.permute.xlu1 %1255 }
 0x211   : > { %v1274_v51 = vcombine.low %v1250_v38, %v1256_v45  ;;  %v1275_v52 = vcombine.high %v1250_v38, %v1256_v45 }
 0x213   : > { %v1282_v56 = vrot.slane %v1274_v51, %v3464_v50  ;;  %v1289_v57 = vrot.slane %v1275_v52, %v3464_v50 }
 0x214   : > { %v1253_v42 = vpop.permute.xlu0 %1252 }
 0x215   : > { %v1258_v48 = vcombine.low %v1243_v30, %v1253_v42  ;;  %v1259_v49 = vcombine.high %v1243_v30, %v1253_v42 }
 0x217   : > { %v1266_v54 = vrot.slane %v1258_v48, %v3464_v50  ;;  %v1273_v55 = vrot.slane %v1259_v49, %v3464_v50  ;;  %v1589_v48 = vand.u32 127, %v897_v41 }
 0x219   : > { %v1290_v59 = vcombine.low %v1266_v54, %v1282_v56  ;;  %v1291_v60 = vcombine.high %v1266_v54, %v1282_v56  ;;  %v1306_v61 = vcombine.low %v1273_v55, %v1289_v57  ;;  %v1307_v62 = vcombine.high %v1273_v55, %v1289_v57 }
 0x21a   : > { %vm1590_vm5 = vcmp.lt.s32.totalorder %v1589_v48, 10 }
 0x21b   : > { %v1298_v63 = vrot.slane %v1290_v59, %v3470_v58  ;;  %v1305_v1 = vrot.slane %v1291_v60, %v3470_v58  ;;  %v1314_v2 = vrot.slane %v1306_v61, %v3470_v58  ;;  %v1321_v3 = vrot.slane %v1307_v62, %v3470_v58 }
 0x21d   : > { %v1326_v4 = vcombine.low %v1298_v63, %v1305_v1  ;;  %v2481_v5 = vcombine.high %v1298_v63, %v1305_v1  ;;  %v1342_v6 = vcombine.low %v1314_v2, %v1321_v3  ;;  %v2482_v7 = vcombine.high %v1314_v2, %v1321_v3 }
 0x21f   : > { %v1333_v8 = vrot.slane %v1326_v4, %v3464_v50  ;;  %v1341_v9 = vrot.slane %v2481_v5, %v3464_v50  ;;  %v1349_v10 = vrot.slane %v1342_v6, %v3464_v50  ;;  %v1357_v11 = vrot.slane %v2482_v7, %v3464_v50 }
 0x221   : > { %v1358_v14 = vcombine.low %v1333_v8, %v1341_v9  ;;  %v1374_v16 = vcombine.low %v1349_v10, %v1357_v11  ;;  %v1359_v21 = vcombine.high %v1333_v8, %v1341_v9  ;;  %v1375_v23 = vcombine.high %v1349_v10, %v1357_v11 }
 0x223   : > { %v1366_v19 = vrot.slane %v1358_v14, %v3470_v58  ;;  %v1382_v20 = vrot.slane %v1374_v16, %v3470_v58  ;;  %v1373_v30 = vrot.slane %v1359_v21, %v3470_v58  ;;  %v1389_v34 = vrot.slane %v1375_v23, %v3470_v58 }
 0x225   : > { %v1390_v25 = vcombine.low %v1366_v19, %v1382_v20  ;;  %v1391_v32 = vcombine.high %v1366_v19, %v1382_v20  ;;  %v1392_v39 = vcombine.low %v1373_v30, %v1389_v34  ;;  %v1393_v44 = vcombine.high %v1373_v30, %v1389_v34 }
 0x227   : > { %v1394_v33 = vpack.c.bf16 %v1390_v25, %v1390_v25  ;;  %v1395_v38 = vpack.c.bf16 %v1391_v32, %v1391_v32  ;;  %v1396_v43 = vpack.c.bf16 %v1392_v39, %v1392_v39  ;;  %v1397_v47 = vpack.c.bf16 %v1393_v44, %v1393_v44 }
 0x247   : > { %v847_v12 = vpop.trf.xlu1 }
 0x248   : > { %v863_v13 = vpack.c.bf16 %v847_v12, %v847_v12 }
 0x24a   : > { %868 = vst.msk [vmem:[#allocation2] sm:$0xf] %vm867_vm2, %v863_v13 }
 0x24b   : > { %v848_v17 = vpop.trf.xlu1 }
 0x24c   : > { %v864_v18 = vpack.c.bf16 %v848_v17, %v848_v17 }
 0x24e   : > { %869 = vst.msk [vmem:[#allocation2 + $0x4] sm:$0xf] %vm867_vm2, %v864_v18 }
 0x24f   : > { %v849_v22 = vpop.trf.xlu1 }
 0x250   : > { %v865_v24 = vpack.c.bf16 %v849_v22, %v849_v22 }
 0x251   : > { %v1398_v27 = vld [vmem:[#allocation2] sm:$0xf] }
 0x252   : > { %870 = vst.msk [vmem:[#allocation2 + $0x8] sm:$0xf] %vm867_vm2, %v865_v24  ;;  %v1408_v28 = vsel %vm1406_vm3, %v1398_v27, 0 }
 0x253   : > { %2586 = vmatpush3.bf16.msra.mxu1 %v1408_v28  ;;  %v850_v29 = vpop.trf.xlu1 }
 0x254   : > { %v866_v31 = vpack.c.bf16 %v850_v29, %v850_v29  ;;  %2597 = vmatprep.subr.bf16.mxu1 %v3096_v0 }
 0x255   : > { %v1399_v35 = vld [vmem:[#allocation2 + $0x4] sm:$0xf] }
 0x256   : > { %871 = vst.msk [vmem:[#allocation2 + $0xc] sm:$0xf] %vm867_vm2, %v866_v31  ;;  %2588 = vmatmul.mubr.msk.bf16.vlgmr.msra.gmra.mrb[0].mxu1 %vm1168_vm4, %v1394_v33  ;;  %v1454_v36 = vsel %vm1406_vm3, %v1399_v35, 0 }
 0x257   : > { %2592 = vmatpush3.bf16.msra.mxu0 %v1454_v36  ;;  %2599 = vmatprep.mubr.msk.bf16.mxu1 %vm3097_vm0, %v3096_v0 }
 0x258   : > { %2603 = vmatprep.subr.bf16.mxu0 %v3096_v0 }
 0x259   : > { %v1400_v40 = vld [vmem:[#allocation2 + $0x8] sm:$0xf] }
 0x25a   : > { %2594 = vmatmul.mubr.msk.bf16.vlgmr.msra.gmra.mrb[12].mxu0 %vm1168_vm4, %v1395_v38  ;;  %v1500_v42 = vsel %vm1406_vm3, %v1400_v40, 0 }
 0x25b   : > { %2598 = vmatpush3.bf16.msra.mxu1 %v1500_v42  ;;  %2605 = vmatprep.mubr.msk.bf16.mxu0 %vm3097_vm0, %v3096_v0 }
 0x25c   : > { %2609 = vmatprep.subr.bf16.mxu1 %v3096_v0 }
 0x25d   : > { %v1401_v45 = vld [vmem:[#allocation2 + $0xc] sm:$0xf] }
 0x25e   : > { %2600 = vmatmul.mubr.msk.bf16.vlgmr.msra.gmra.mrb[4].mxu1 %vm1168_vm4, %v1396_v43  ;;  %v1546_v46 = vsel %vm1406_vm3, %v1401_v45, 0 }
 0x25f   : > { %2604 = vmatpush3.bf16.msra.mxu0 %v1546_v46  ;;  %2611 = vmatprep.mubr.msk.bf16.mxu1 %vm3097_vm0, %v3096_v0 }
 0x260   : > { %2615 = vmatprep.subr.bf16.mxu0 %v3096_v0 }
 0x262   : > { %2606 = vmatmul.mubr.msk.bf16.vlgmr.msra.gmra.mrb[16].mxu0 %vm1168_vm4, %v1397_v47 }
 0x263   : > { %2617 = vmatprep.mubr.msk.bf16.mxu0 %vm3097_vm0, %v3096_v0  ;;  %v875_v38 = vpop.permute.xlu1 %874 }
 0x329   : > { %v1444_v49 = vpop.f32.mrb[0].mxu1 }
 0x32a   : > { %v1593_v51 = vsel %vm1590_vm5, %v1444_v49, -1e+30  ;;  %v2589_v52 = vpop.f32.mrb[1].mxu1 }
 0x32b   : > { %v1447_v53 = vpop.f32.mrb[2].mxu1  ;;  %v1598_v54 = vsel %vm1597_vm6, %v1593_v51, -inf }
 0x32c   : > { %1599 = vmax.xlane.f32.xlu0 %v1598_v54  ;;  %v2590_v55 = vpop.f32.mrb[3].mxu1 }
 0x32d   : > { %v1490_v56 = vpop.f32.mrb[12].mxu0 }
 0x32e   : > { %v1594_v57 = vsel %vm1590_vm5, %v1490_v56, -1e+30  ;;  %v2595_v59 = vpop.f32.mrb[13].mxu0 }
 0x32f   : > { %v1493_v60 = vpop.f32.mrb[14].mxu0  ;;  %v1601_v61 = vsel %vm1597_vm6, %v1594_v57, -inf }
 0x330   : > { %1602 = vmax.xlane.f32.xlu0 %v1601_v61  ;;  %v2596_v41 = vpop.f32.mrb[15].mxu0 }
 0x331   : > { %v1536_v62 = vpop.f32.mrb[4].mxu1 }
 0x332   : > { %v1595_v63 = vsel %vm1590_vm5, %v1536_v62, -1e+30  ;;  %v2601_v1 = vpop.f32.mrb[5].mxu1 }
 0x333   : > { %v1539_v2 = vpop.f32.mrb[6].mxu1  ;;  %v1604_v3 = vsel %vm1597_vm6, %v1595_v63, -inf }
 0x334   : > { %v2602_v4 = vpop.f32.mrb[7].mxu1  ;;  %1605 = vmax.xlane.f32.xlu0 %v1604_v3 }
 0x335   : > { %v1582_v5 = vpop.f32.mrb[16].mxu0 }
 0x336   : > { %v1596_v6 = vsel %vm1590_vm5, %v1582_v5, -1e+30  ;;  %v2607_v7 = vpop.f32.mrb[17].mxu0 }
 0x337   : > { %v1585_v8 = vpop.f32.mrb[18].mxu0  ;;  %v1607_v9 = vsel %vm1597_vm6, %v1596_v6, -inf }
 0x338   : > { %1608 = vmax.xlane.f32.xlu0 %v1607_v9  ;;  %v2608_v10 = vpop.f32.mrb[19].mxu0 }
 0x34e   : > { %876 = vrot.lane.b32.xlu0 %v3448_v26, %s3099_s24  ;;  %s3818_s24 = sld [smem:[#allocation34_spill]] }
 0x352   : > { %880 = vrot.lane.b32.xlu0 %v3459_v37, %s3100_s19 }
 0x356   : > { %882 = vrot.lane.b32.xlu0 %v3448_v26, %s3100_s19  ;;  %s3819_s19 = sld [smem:[#allocation19_spill]] }
 0x35a   : > { %886 = vrot.lane.b32.xlu0 %v3459_v37, %s3098_s2 }
 0x35c   : > { %s673_s23 = sand.u32 1, %s3819_s19  }
 0x35d   : > { %s2459_s25 = sshll.u32 %s673_s23, 3  ;;  %s2284_s19 = scalar_lea.sflag [#allocation6], %s673_s23 }
 0x35e   : > { %888 = vrot.lane.b32.xlu0 %v3448_v26, %s3098_s2  ;;  %s675_s15 = scalar_lea.vmem [#allocation13], %s2459_s25  ;;  %s3106_s25 = smov [#allocation13]  }
 0x3b9   : > { %v1600_v11 = vpop.xlane.xlu0 %1599 }
 0x3ba   : > { %v1610_v12 = vsub.f32 %v1593_v51, %v1600_v11 }
 0x3bc   : > { %v1614_v13 = vmul.f32 1.442695, %v1610_v12 }
 0x3bd   : > { %v1603_v14 = vpop.xlane.xlu0 %1602 }
 0x3be   : > { %2821 = vpow2.f32 %v1614_v13  ;;  %v1611_v16 = vsub.f32 %v1594_v57, %v1603_v14 }
 0x3c0   : > { %v1616_v17 = vmul.f32 1.442695, %v1611_v16 }
 0x3c1   : > { %v1606_v18 = vpop.xlane.xlu0 %1605 }
 0x3c2   : > { %2823 = vpow2.f32 %v1616_v17  ;;  %v1612_v19 = vsub.f32 %v1595_v63, %v1606_v18 }
 0x3c4   : > { %v1618_v20 = vmul.f32 1.442695, %v1612_v19 }
 0x3c5   : > { %v1609_v21 = vpop.xlane.xlu0 %1608 }
 0x3c6   : > { %2825 = vpow2.f32 %v1618_v20  ;;  %v1613_v22 = vsub.f32 %v1596_v6, %v1609_v21 }
 0x3c8   : > { %v3527_v23 = vpop.eup %2821  ;;  %v1620_v24 = vmul.f32 1.442695, %v1613_v22 }
 0x3c9   : > { %v877_v25 = vpop.permute.xlu0 %876  ;;  %v1622_v27 = vsel %vm1597_vm6, %v3527_v23, 0.0 }
 0x3ca   : > { %2827 = vpow2.f32 %v1620_v24  ;;  %1623 = vadd.xlane.f32.xlu1 %v1622_v27 }
 0x3cc   : > { %v3531_v28 = vpop.eup %2823 }
 0x3cd   : > { %v881_v29 = vpop.permute.xlu0 %880  ;;  %v1625_v30 = vsel %vm1597_vm6, %v3531_v28, 0.0 }
 0x3ce   : > { %1626 = vadd.xlane.f32.xlu0 %v1625_v30  ;;  %v892_v35 = vcombine.low %v3459_v37, %v881_v29  ;;  %v893_v36 = vcombine.high %v3459_v37, %v881_v29 }
 0x3d0   : > { %v3535_v31 = vpop.eup %2825  ;;  %v900_v44 = vrot.slane %v892_v35, %v3464_v50  ;;  %v907_v45 = vrot.slane %v893_v36, %v3464_v50 }
 0x3d1   : > { %v883_v32 = vpop.permute.xlu0 %882  ;;  %v1628_v33 = vsel %vm1597_vm6, %v3535_v31, 0.0 }
 0x3d2   : > { %1629 = vadd.xlane.f32.xlu0 %v1628_v33  ;;  %v960_v48 = vcombine.low %v3448_v26, %v883_v32  ;;  %v961_v37 = vcombine.high %v3448_v26, %v883_v32 }
 0x3d4   : > { %v3539_v34 = vpop.eup %2827  ;;  %v968_v41 = vrot.slane %v960_v48, %v3464_v50  ;;  %v975_v62 = vrot.slane %v961_v37, %v3464_v50 }
 0x3d5   : > { %v887_v39 = vpop.permute.xlu0 %886  ;;  %v1631_v40 = vsel %vm1597_vm6, %v3539_v34, 0.0 }
 0x3d6   : > { %v908_v42 = vcombine.low %v875_v38, %v887_v39  ;;  %v909_v43 = vcombine.high %v875_v38, %v887_v39  ;;  %1632 = vadd.xlane.f32.xlu1 %v1631_v40 }
 0x3d8   : > { %v916_v46 = vrot.slane %v908_v42, %v3464_v50  ;;  %v923_v47 = vrot.slane %v909_v43, %v3464_v50 }
 0x3d9   : > { %v889_v49 = vpop.permute.xlu0 %888 }
 0x3da   : > { %v924_v51 = vcombine.low %v900_v44, %v916_v46  ;;  %v925_v52 = vcombine.high %v900_v44, %v916_v46  ;;  %v940_v53 = vcombine.low %v907_v45, %v923_v47  ;;  %v941_v54 = vcombine.high %v907_v45, %v923_v47 }
 0x3db   : > { %v976_v55 = vcombine.low %v877_v25, %v889_v49  ;;  %v977_v56 = vcombine.high %v877_v25, %v889_v49 }
 0x3dc   : > { %v932_v57 = vrot.slane %v924_v51, %v3470_v58  ;;  %v939_v59 = vrot.slane %v925_v52, %v3470_v58  ;;  %v948_v60 = vrot.slane %v940_v53, %v3470_v58  ;;  %v955_v61 = vrot.slane %v941_v54, %v3470_v58 }
 0x3dd   : > { %v984_v26 = vrot.slane %v976_v55, %v3464_v50  ;;  %v991_v63 = vrot.slane %v977_v56, %v3464_v50 }
 0x3de   : > { %v1028_v1 = vcombine.low %v932_v57, %v939_v59  ;;  %v2472_v2 = vcombine.high %v932_v57, %v939_v59  ;;  %v1044_v3 = vcombine.low %v948_v60, %v955_v61  ;;  %v2473_v4 = vcombine.high %v948_v60, %v955_v61 }
 0x3df   : > { %v992_v5 = vcombine.low %v968_v41, %v984_v26  ;;  %v993_v6 = vcombine.high %v968_v41, %v984_v26  ;;  %v1008_v7 = vcombine.low %v975_v62, %v991_v63  ;;  %v1009_v8 = vcombine.high %v975_v62, %v991_v63 }
 0x3e0   : > { %v1035_v9 = vrot.slane %v1028_v1, %v3464_v50  ;;  %v1043_v10 = vrot.slane %v2472_v2, %v3464_v50  ;;  %v1051_v11 = vrot.slane %v1044_v3, %v3464_v50  ;;  %v1059_v12 = vrot.slane %v2473_v4, %v3464_v50 }
 0x3e1   : > { %v1000_v13 = vrot.slane %v992_v5, %v3470_v58  ;;  %v1007_v14 = vrot.slane %v993_v6, %v3470_v58  ;;  %v1016_v16 = vrot.slane %v1008_v7, %v3470_v58  ;;  %v1023_v17 = vrot.slane %v1009_v8, %v3470_v58 }
 0x3e2   : > { %v1060_v18 = vcombine.low %v1035_v9, %v1043_v10  ;;  %v1061_v19 = vcombine.high %v1035_v9, %v1043_v10  ;;  %v1076_v20 = vcombine.low %v1051_v11, %v1059_v12  ;;  %v1077_v21 = vcombine.high %v1051_v11, %v1059_v12 }
 0x3e3   : > { %v1096_v22 = vcombine.low %v1000_v13, %v1007_v14  ;;  %v2474_v24 = vcombine.high %v1000_v13, %v1007_v14  ;;  %v1112_v25 = vcombine.low %v1016_v16, %v1023_v17  ;;  %v2475_v27 = vcombine.high %v1016_v16, %v1023_v17 }
 0x3e4   : > { %v1068_v35 = vrot.slane %v1060_v18, %v3470_v58  ;;  %v1075_v36 = vrot.slane %v1061_v19, %v3470_v58  ;;  %v1084_v38 = vrot.slane %v1076_v20, %v3470_v58  ;;  %v1091_v39 = vrot.slane %v1077_v21, %v3470_v58 }
 0x3e5   : > { %v1103_v29 = vrot.slane %v1096_v22, %v3464_v50  ;;  %v1111_v30 = vrot.slane %v2474_v24, %v3464_v50  ;;  %v1119_v32 = vrot.slane %v1112_v25, %v3464_v50  ;;  %v1127_v33 = vrot.slane %v2475_v27, %v3464_v50 }
 0x3e6   : > { %v1092_v37 = vcombine.low %v1068_v35, %v1084_v38  ;;  %v1093_v49 = vcombine.high %v1068_v35, %v1084_v38  ;;  %v1094_v51 = vcombine.low %v1075_v36, %v1091_v39  ;;  %v1095_v52 = vcombine.high %v1075_v36, %v1091_v39 }
 0x3e7   : > { %v1128_v40 = vcombine.low %v1103_v29, %v1111_v30  ;;  %v1129_v42 = vcombine.high %v1103_v29, %v1111_v30  ;;  %v1144_v43 = vcombine.low %v1119_v32, %v1127_v33  ;;  %v1145_v44 = vcombine.high %v1119_v32, %v1127_v33 }
 0x3e9   : > { %v1136_v45 = vrot.slane %v1128_v40, %v3470_v58  ;;  %v1143_v46 = vrot.slane %v1129_v42, %v3470_v58  ;;  %v1152_v47 = vrot.slane %v1144_v43, %v3470_v58  ;;  %v1159_v48 = vrot.slane %v1145_v44, %v3470_v58 }
 0x3eb   : > { %v1160_v53 = vcombine.low %v1136_v45, %v1152_v47  ;;  %v1161_v54 = vcombine.high %v1136_v45, %v1152_v47  ;;  %v1162_v55 = vcombine.low %v1143_v46, %v1159_v48  ;;  %v1163_v56 = vcombine.high %v1143_v46, %v1159_v48 }
 0x3ed   : > { %v1164_v57 = vpack.c.bf16 %v1160_v53, %v1092_v37  ;;  %v1165_v59 = vpack.c.bf16 %v1161_v54, %v1093_v49  ;;  %v1166_v60 = vpack.c.bf16 %v1162_v55, %v1094_v51  ;;  %v1167_v61 = vpack.c.bf16 %v1163_v56, %v1095_v52  ;;  %v2809_v37 = vld [vmem:[#allocation10] sm:$0xff]  }
 0x3ef   : > { %1169 = vst.msk [vmem:[#allocation3] sm:$0xff] %vm1168_vm4, %v1164_v57  ;;  %1170 = vst.msk [vmem:[#allocation3 + $0x8] sm:$0xff] %vm1168_vm4, %v1165_v59  ;;  %v2810_v59 = vld [vmem:[#allocation10 + $0x8] sm:$0xff]  }
 0x3f0   : > { %1171 = vst.msk [vmem:[#allocation3 + $0x10] sm:$0xff] %vm1168_vm4, %v1166_v60  ;;  %1172 = vst.msk [vmem:[#allocation3 + $0x18] sm:$0xff] %vm1168_vm4, %v1167_v61 }
 0x3f6   : > { %v1646_v41 = vld [vmem:[#allocation3] sm:$0xff]  ;;  %v1647_v62 = vld [vmem:[#allocation3 + $0x8] sm:$0xff] }
 0x3f7   : > { %2610 = vmatpush3.bf16.msra.mxu1 %v1646_v41  ;;  %2616 = vmatpush3.bf16.msra.mxu0 %v1647_v62  ;;  %v1648_v8 = vld [vmem:[#allocation3 + $0x10] sm:$0xff] }
 0x3f8   : > { %2621 = vmatprep.subr.bf16.mxu1 %v3096_v0  ;;  %2627 = vmatprep.subr.bf16.mxu0 %v3096_v0 }
 0x457   : > { %v1624_v26 = vpop.xlane.xlu1 %1623 }
 0x458   : > { %2829 = vrcp.f32 %v1624_v26 }
 0x45b   : > { %v1627_v63 = vpop.xlane.xlu0 %1626 }
 0x45c   : > { %2831 = vrcp.f32 %v1627_v63 }
 0x45f   : > { %v1630_v1 = vpop.xlane.xlu0 %1629 }
 0x460   : > { %2833 = vrcp.f32 %v1630_v1 }
 0x462   : > { %v2830_v2 = vpop.eup %2829 }
 0x463   : > { %v1638_v3 = vmul.f32 %v2830_v2, %v3527_v23  ;;  %v1633_v4 = vpop.xlane.xlu1 %1632  ;;  %v1649_v23 = vld [vmem:[#allocation3 + $0x18] sm:$0xff] }
 0x464   : > { %2835 = vrcp.f32 %v1633_v4 }
 0x465   : > { %v1642_v5 = vpack.c.bf16 %v1638_v3, %v1638_v3 }
 0x466   : > { %v2832_v6 = vpop.eup %2831 }
 0x467   : > { %v1639_v7 = vmul.f32 %v2832_v6, %v3531_v28  ;;  %2612 = vmatmul.mubr.msk.bf16.vlgmr.msra.gmra.mrb[8].mxu1 %vm1597_vm6, %v1642_v5 }
 0x468   : > { %2622 = vmatpush3.bf16.msra.mxu1 %v1648_v8  ;;  %2623 = vmatprep.mubr.msk.bf16.mxu1 %vm3097_vm0, %v3096_v0 }
 0x469   : > { %v1643_v9 = vpack.c.bf16 %v1639_v7, %v1639_v7  ;;  %2633 = vmatprep.subr.bf16.mxu1 %v3096_v0 }
 0x46a   : > { %v2834_v10 = vpop.eup %2833 }
 0x46b   : > { %v1640_v11 = vmul.f32 %v2834_v10, %v3535_v31  ;;  %2618 = vmatmul.mubr.msk.bf16.vlgmr.msra.gmra.mrb[20].mxu0 %vm1597_vm6, %v1643_v9 }
 0x46c   : > { %2628 = vmatpush3.bf16.msra.mxu0 %v1649_v23  ;;  %2629 = vmatprep.mubr.msk.bf16.mxu0 %vm3097_vm0, %v3096_v0 }
 0x46d   : > { %v1644_v28 = vpack.c.bf16 %v1640_v11, %v1640_v11  ;;  %2641 = vmatprep.subr.bf16.mxu0 %v3096_v0 }
 0x46e   : > { %v2836_v12 = vpop.eup %2835 }
 0x46f   : > { %v1641_v13 = vmul.f32 %v2836_v12, %v3539_v34  ;;  %2624 = vmatmul.mubr.msk.bf16.vlgmr.msra.gmra.mrb[12].mxu1 %vm1597_vm6, %v1644_v28 }
 0x470   : > { %2637 = vmatprep.mubr.msk.bf16.mxu1 %vm3097_vm0, %v3096_v0  ;;  %2634 = vmatpush3.bf16.msra.mxu1 %v2809_v37 }
 0x471   : > { %v1645_v14 = vpack.c.bf16 %v1641_v13, %v1641_v13  ;;  %2635 = vmatprep.subr.bf16.mxu1 %v3096_v0 }
 0x473   : > { %2630 = vmatmul.mubr.msk.bf16.vlgmr.msra.gmra.mrb[24].mxu0 %vm1597_vm6, %v1645_v14  ;;  %v2493_v14 = vld [vmem:[#allocation12] ss:$0 sm:$0xff] }
 0x474   : > { %2645 = vmatprep.mubr.msk.bf16.mxu0 %vm3097_vm0, %v3096_v0  ;;  %2636 = vmatpush3.bf16.msra.mxu1 %v2810_v59 }
 0x475   : > { %2649 = vmatprep.subr.bf16.mxu1 %v3096_v0 }
 0x53a   : > { %v1687_v31 = vpop.f32.mrb[8].mxu1 }
 0x53b   : > { %v2613_v16 = vpop.f32.mrb[9].mxu1 }
 0x53c   : > { %v1690_v17 = vpop.f32.mrb[10].mxu1 }
 0x53d   : > { %v2614_v18 = vpop.f32.mrb[11].mxu1 }
 0x53e   : > { %v1730_v19 = vpop.f32.mrb[20].mxu0 }
 0x53f   : > { %v2619_v20 = vpop.f32.mrb[21].mxu0 }
 0x540   : > { %v1733_v21 = vpop.f32.mrb[22].mxu0 }
 0x541   : > { %v2620_v22 = vpop.f32.mrb[23].mxu0 }
 0x542   : > { %v1773_v34 = vpop.f32.mrb[12].mxu1 }
 0x543   : > { %v1822_v24 = vcombine.low %v1687_v31, %v1773_v34  ;;  %v1823_v25 = vcombine.high %v1687_v31, %v1773_v34  ;;  %v2625_v27 = vpop.f32.mrb[13].mxu1 }
 0x544   : > { %v1776_v29 = vpop.f32.mrb[14].mxu1 }
 0x545   : > { %v2626_v30 = vpop.f32.mrb[15].mxu1  ;;  %v1830_v39 = vrot.slane %v1822_v24, %v3464_v50  ;;  %v1837_v40 = vrot.slane %v1823_v25, %v3464_v50  ;;  %v2811_v29 = vld [vmem:[%s3760_s12] sm:$0xff]  }
 0x546   : > { %v1816_v32 = vpop.f32.mrb[24].mxu0  ;;  %2642 = vmatpush3.bf16.msra.mxu0 %v2811_v29  ;;  %v2812_v30 = vld [vmem:[%s3760_s12 + $0x8] sm:$0xff]  }
 0x547   : > { %v1838_v33 = vcombine.low %v1730_v19, %v1816_v32  ;;  %v1839_v35 = vcombine.high %v1730_v19, %v1816_v32  ;;  %v2631_v36 = vpop.f32.mrb[25].mxu0  ;;  %2643 = vmatprep.subr.bf16.mxu0 %v3096_v0  ;;  %v2814_v32 = vld [vmem:[%s3762_s14 + $0x8] sm:$0xff]  }
 0x548   : > { %v1819_v38 = vpop.f32.mrb[26].mxu0  ;;  %v2817_v36 = vld [vmem:[%s3762_s14 + $0x20] sm:$0xff]  }
 0x549   : > { %v1846_v42 = vrot.slane %v1838_v33, %v3464_v50  ;;  %v1853_v43 = vrot.slane %v1839_v35, %v3464_v50  ;;  %v2632_v44 = vpop.f32.mrb[27].mxu0  ;;  %v2815_v33 = vld [vmem:[%s3762_s14 + $0x10] sm:$0xff]   ;;  %v2816_v35 = vld [vmem:[%s3762_s14 + $0x18] sm:$0xff]   ;;  %v2818_v38 = vld [vmem:[%s3762_s14 + $0x28] sm:$0xff]  }
 0x54a   : > { %2644 = vmatpush3.bf16.msra.mxu0 %v2812_v30  ;;  %v2497_v44 = vld [vmem:[%s3758_s10] ss:$0 sm:$0xff] }
 0x54b   : > { %v1854_v45 = vcombine.low %v1830_v39, %v1846_v42  ;;  %v1855_v46 = vcombine.high %v1830_v39, %v1846_v42  ;;  %v1870_v47 = vcombine.low %v1837_v40, %v1853_v43  ;;  %v1871_v48 = vcombine.high %v1837_v40, %v1853_v43 }
 0x54d   : > { %v1862_v49 = vrot.slane %v1854_v45, %v3470_v58  ;;  %v1869_v51 = vrot.slane %v1855_v46, %v3470_v58  ;;  %v1878_v52 = vrot.slane %v1870_v47, %v3470_v58  ;;  %v1885_v53 = vrot.slane %v1871_v48, %v3470_v58  ;;  %v2498_v46 = vld [vmem:[%s3759_s11] ss:$0 sm:$0xff] }
 0x54f   : > { %v1890_v54 = vcombine.low %v1862_v49, %v1869_v51  ;;  %v2491_v55 = vcombine.high %v1862_v49, %v1869_v51  ;;  %v1906_v56 = vcombine.low %v1878_v52, %v1885_v53  ;;  %v2492_v57 = vcombine.high %v1878_v52, %v1885_v53  ;;  %v2819_v49 = vld [vmem:[%s3762_s14 + $0x30] sm:$0xff]   ;;  %v2820_v51 = vld [vmem:[%s3762_s14 + $0x38] sm:$0xff]   ;;  %v2499_v52 = vld [vmem:[%s3817_s20] ss:$0 sm:$0xff]  ;;  %s2300_s20 = sshll.u32 %s675_s15, 4  ;;  %s3696_s20 = int_to_ptr.vmem [resolvable:$true] %s2300_s20 }
 0x551   : > { %v1897_v60 = vrot.slane %v1890_v54, %v3464_v50  ;;  %v1905_v61 = vrot.slane %v2491_v55, %v3464_v50  ;;  %v1913_v41 = vrot.slane %v1906_v56, %v3464_v50  ;;  %v1921_v62 = vrot.slane %v2492_v57, %v3464_v50 }
 0x553   : > { %v1923_v26 = vcombine.high %v1897_v60, %v1905_v61  ;;  %v1939_v63 = vcombine.high %v1913_v41, %v1921_v62  ;;  %v1922_v1 = vcombine.low %v1897_v60, %v1905_v61  ;;  %v1938_v2 = vcombine.low %v1913_v41, %v1921_v62 }
 0x555   : > { %v1937_v3 = vrot.slane %v1923_v26, %v3470_v58  ;;  %v1953_v4 = vrot.slane %v1939_v63, %v3470_v58  ;;  %v1930_v5 = vrot.slane %v1922_v1, %v3470_v58  ;;  %v1946_v6 = vrot.slane %v1938_v2, %v3470_v58 }
 0x557   : > { %v1956_v7 = vcombine.low %v1937_v3, %v1953_v4  ;;  %v1955_v8 = vcombine.high %v1930_v5, %v1946_v6  ;;  %v1957_v9 = vcombine.high %v1937_v3, %v1953_v4  ;;  %v1954_v10 = vcombine.low %v1930_v5, %v1946_v6 }
 0x559   : > { %1963 = vrot.lane.b32.xlu1 %v1956_v7, %s3103_s16  ;;  %1959 = vrot.lane.b32.xlu0 %v1955_v8, %s3104_s6  ;;  %s2515_s16 = sshll.u32 %s3075_s0, 1  ;;  %s3823_s0 = sld [smem:[#allocation37_spill]] }
 0x55a   : > { %s2296_s6 = sadd.s32 %s3071_s30, %s2515_s16  ;;  %s2981_s16 = scalar_lea.vmem %s3696_s20, 128 }
 0x55b   : > { %s2516_s27 = sshll.u32 %s2296_s6, 7  ;;  %p2982_p2 = scmp.ne.s32.totalorder %s3696_s20, %s2981_s16 }
 0x55c   : > { %s2985_s6 = sshll.u32 %s3106_s25, 4  ;;  %s2986_s6 = int_to_ptr.vmem [resolvable:$false] %s2985_s6 }
 0x55d   : > { %1967 = vrot.lane.b32.xlu1 %v1957_v9, %s3105_s13  ;;  %s3820_s13 = sld [smem:[#allocation25_spill]]  ;;  %s2987_s28 = scalar_lea.vmem %s2986_s6, 256 }
 0x55e   : > { %p2988_p4 = scmp.lt.s32.totalorder %s3696_s20, %s2986_s6  ;;  %p2989_p5 = scmp.lt.s32.totalorder %s2987_s28, %s2981_s16 }
 0x55f   : > { %s3694_s30 = scalar_lea.hbm %s3823_s0, %s2516_s27 }
 0x560   : > { %p2990_p6 = por %p2989_p5, %p2988_p4 }
 0x563   : > { %p3825_p10 = scmp.ne.s32.totalorder %s3820_s13, 0 }
 0x565   : > { %p2983_p12 = pnand %p2982_p2, %p3825_p10 }
 0x567   : > { %p2984_p1 = pneg %p2983_p12 }
 0x569   : > { %p2991_p7 = pnand %p2990_p6, %p2984_p1 }
 0x5cb   : > { %v1964_v50 = vpop.permute.xlu1 %1963  ;;  %v1960_v11 = vpop.permute.xlu0 %1959 }
 0x5cc   : > { %v1970_v23 = vsel %vm1168_vm4, %v1954_v10, %v1960_v11  ;;  %v2512_v11 = vld [vmem:[%s3821_s26] ss:$0 sm:$0xff] }
 0x5cd   : > { %v1971_v12 = vsel %vm1597_vm6, %v1970_v23, %v1964_v50 }
 0x5cf   : > { %v1968_v28 = vpop.permute.xlu1 %1967 }
 0x5d0   : > { %v1973_v13 = vsel %vm1972_vm7, %v1971_v12, %v1968_v28  ;;  %v2513_v28 = vld [vmem:[%s3822_s1] ss:$0 sm:$0xff] }
 0x5d1   : > { %v1974_v58 = vpack.c.bf16 %v1973_v13, %v1973_v13 }
 0x5d3   : > { %2638 = vmatmul.mubr.msk.bf16.vlgmr.msra.gmra.mrb[16].mxu1 %vm722_vm1, %v1974_v58 }
 0x5d4   : > { %2665 = vmatprep.mubr.msk.bf16.mxu1 %vm3097_vm0, %v3096_v0 }
 0x6a6   : > { %v2035_v31 = vpop.f32.mrb[16].mxu1 }
 0x6a7   : > { %v2036_v16 = vadd.f32 %v2493_v14, %v2035_v31  ;;  %v2639_v17 = vpop.f32.mrb[17].mxu1 }
 0x6a8   : > { %v2038_v18 = vpop.f32.mrb[18].mxu1 }
 0x6a9   : > { %v2640_v19 = vpop.f32.mrb[19].mxu1  ;;  %v2041_v20 = vadd.f32 %v2036_v16, %v3434_v15  ;;  %v2813_v15 = vld [vmem:[%s3762_s14] sm:$0xff]  }
 0x6aa   : > { %2650 = vmatpush3.bf16.msra.mxu1 %v2813_v15 }
 0x6ab   : > { %v2042_v21 = vsel %vm722_vm1, %v2041_v20, 0.0  ;;  %2651 = vmatprep.subr.bf16.mxu1 %v3096_v0 }
 0x6ac   : > { %2043 = vadd.xlane.f32.xlu0 %v2042_v21 }
 0x6ae   : > { %2652 = vmatpush3.bf16.msra.mxu1 %v2814_v32 }
 0x6af   : > { %2653 = vmatprep.subr.bf16.mxu1 %v3096_v0 }
 0x6b2   : > { %2654 = vmatpush3.bf16.msra.mxu1 %v2815_v33 }
 0x6b3   : > { %2655 = vmatprep.subr.bf16.mxu1 %v3096_v0 }
 0x6b6   : > { %2656 = vmatpush3.bf16.msra.mxu1 %v2816_v35 }
 0x6b7   : > { %2657 = vmatprep.subr.bf16.mxu1 %v3096_v0 }
 0x6ba   : > { %2658 = vmatpush3.bf16.msra.mxu1 %v2817_v36 }
 0x6bb   : > { %2659 = vmatprep.subr.bf16.mxu1 %v3096_v0 }
 0x6be   : > { %2660 = vmatpush3.bf16.msra.mxu1 %v2818_v38 }
 0x6bf   : > { %2661 = vmatprep.subr.bf16.mxu1 %v3096_v0 }
 0x6c2   : > { %2662 = vmatpush3.bf16.msra.mxu1 %v2819_v49 }
 0x6c3   : > { %2663 = vmatprep.subr.bf16.mxu1 %v3096_v0  ;;  %v2503_v0 = vld [vmem:[%s3818_s24] ss:$0 sm:$0xff]  ;;  %s3824_s24 = smov %s3823_s0 }
 0x6c6   : > { %2664 = vmatpush3.bf16.msra.mxu1 %v2820_v51 }
 0x739   : > { %v2044_v22 = vpop.xlane.xlu0 %2043 }
 0x73a   : > { %v2046_v34 = vmul.f32 0.03125, %v2044_v22 }
 0x73c   : > { %v2047_v24 = vsub.f32 %v2041_v20, %v2046_v34 }
 0x73e   : > { %v2048_v25 = vmul.f32 %v2047_v24, %v2047_v24 }
 0x740   : > { %v2049_v27 = vsel %vm722_vm1, %v2048_v25, 0.0 }
 0x741   : > { %2050 = vadd.xlane.f32.xlu1 %v2049_v27 }
 0x7ce   : > { %v2051_v39 = vpop.xlane.xlu1 %2050 }
 0x7cf   : > { %v2052_v40 = vmul.f32 0.03125, %v2051_v39 }
 0x7d1   : > { %v2053_v42 = vadd.f32 1e-05, %v2052_v40 }
 0x7d3   : > { %2837 = vrsqrt.f32 %v2053_v42 }
 0x7dd   : > { %v2838_v43 = vpop.eup %2837 }
 0x7de   : > { %v2055_v45 = vmul.f32 %v2838_v43, %v2047_v24 }
 0x7e0   : > { %v2063_v47 = vmul.f32 %v2497_v44, %v2055_v45 }
 0x7e2   : > { %v2071_v48 = vadd.f32 %v2498_v46, %v2063_v47 }
 0x7e4   : > { %v2072_v37 = vpack.c.bf16 %v2071_v48, %v2071_v48 }
 0x7e6   : > { %2646 = vmatmul.mubr.msk.bf16.vlgmr.msra.gmra.mrb[28].mxu0 %vm722_vm1, %v2072_v37 }
 0x8b9   : > { %v2133_v53 = vpop.f32.mrb[28].mxu0 }
 0x8ba   : > { %v2134_v54 = vadd.f32 %v2499_v52, %v2133_v53  ;;  %v2647_v55 = vpop.f32.mrb[29].mxu0 }
 0x8bb   : > { %v2136_v56 = vpop.f32.mrb[30].mxu0 }
 0x8bc   : > { %v2139_v57 = vmax.f32 %v2134_v54, 0.0  ;;  %v2648_v59 = vpop.f32.mrb[31].mxu0 }
 0x8be   : > { %v2140_v60 = vpack.c.bf16 %v2139_v57, %v2139_v57 }
 0x8c0   : > { %2666 = vmatmul.mubr.bf16.vlgmr.msra.gmra.mrb[20].mxu1 %v2140_v60 }
 0x993   : > { %v2246_v61 = vpop.f32.mrb[20].mxu1 }
 0x994   : > { %v2247_v41 = vadd.f32 %v2503_v0, %v2246_v61  ;;  %v2667_v62 = vpop.f32.mrb[21].mxu1 }
 0x995   : > { %v2249_v26 = vpop.f32.mrb[22].mxu1 }
 0x996   : > { %v2668_v63 = vpop.f32.mrb[23].mxu1  ;;  %v2252_v1 = vadd.f32 %v2247_v41, %v2071_v48 }
 0x998   : > { %v2253_v2 = vsel %vm722_vm1, %v2252_v1, 0.0 }
 0x999   : > { %2254 = vadd.xlane.f32.xlu0 %v2253_v2 }
 0xa26   : > { %v2255_v3 = vpop.xlane.xlu0 %2254 }
 0xa27   : > { %v2256_v4 = vmul.f32 0.03125, %v2255_v3 }
 0xa29   : > { %v2257_v5 = vsub.f32 %v2252_v1, %v2256_v4 }
 0xa2b   : > { %v2258_v6 = vmul.f32 %v2257_v5, %v2257_v5 }
 0xa2d   : > { %v2259_v7 = vsel %vm722_vm1, %v2258_v6, 0.0 }
 0xa2e   : > { %2260 = vadd.xlane.f32.xlu0 %v2259_v7 }
 0xabb   : > { %v2261_v8 = vpop.xlane.xlu0 %2260 }
 0xabc   : > { %v2262_v9 = vmul.f32 0.03125, %v2261_v8 }
 0xabe   : > { %v2263_v10 = vadd.f32 1e-05, %v2262_v9 }
 0xac0   : > { %2839 = vrsqrt.f32 %v2263_v10 }
 0xaca   : > { %v2840_v50 = vpop.eup %2839 }
 0xacb   : > { %v2265_v23 = vmul.f32 %v2840_v50, %v2257_v5 }
 0xacd   : > { %v2273_v12 = vmul.f32 %v2512_v11, %v2265_v23 }
 0xacf   : > { %v2281_v13 = vadd.f32 %v2513_v28, %v2273_v12 }
 0xad1   : > { %2282 = vst.msk [vmem:[%s675_s15] sm:$0xff] %vm722_vm1, %v2281_v13 }
 0xad2   : > { %2994 = shalt.err (!%p2991_p7)
}
 0xad3   : > { %s2995_s23 = scalar_lea.hbm %s3694_s30, 128  ;;  %s2999_s21 = scalar_lea.hbm %s3824_s24, 512 }
 0xad4   : > { %p2996_p9 = scmp.ne.s32.totalorder %s3694_s30, %s2995_s23  ;;  %p3000_p3 = scmp.lt.u32.totalorder %s3694_s30, %s3824_s24 }
 0xad5   : > { %p3001_p8 = scmp.lt.u32.totalorder %s2999_s21, %s2995_s23  ;;  %p3003_p2 = scmp.lt.u32.totalorder %s2995_s23, %s3694_s30 }
 0xad6   : > { %p2997_p11 = pnand %p2996_p9, %p3825_p10 }
 0xad7   : > { %p3002_p0 = por %p3001_p8, %p3000_p3 }
 0xad8   : > { %p2998_p13 = pneg %p2997_p11 }
 0xad9   : > { %p3004_p12 = por %p3003_p2, %p3002_p0 }
 0xadb   : > { %p3005_p1 = pnand %p3004_p12, %p2998_p13 }
 0xadd   : > { %3008 = shalt.err (!%p3005_p1)
}
 0xade   : > { %2689 = dma.vmem_to_hbm [thread:$0]  (%p3825_p10), %s3696_s20, 128, %s3694_s30, %s2284_s19  }
 0xadf PF: > { %s3826_s27 = sld [smem:[#allocation23_spill]]  ;;  %s3827_s15 = sld [smem:[#allocation18_spill]] }
 0xae0   : > { %s3828_s18 = sld [smem:[#allocation27_spill]] }
 0xae5   : > { %p2721_p4 = scmp.ge.s32.totalorder %s3826_s27, 2  ;;  %s2312_s2 = sand.u32 1, %s3827_s15  }
 0xae6   : > { %p3829_p5 = scmp.ne.s32.totalorder %s3828_s18, 0  ;;  %s2313_s0 = scalar_lea.sflag [#allocation6], %s2312_s2 }
 0xae8   : > { %p2708_p6 = pnand %p2721_p4, %p3829_p5 }
 0xaea   : > { %3054 = dma.done.wait (!%p2708_p6), %s2313_s0, 128  }
 0xaeb   : > { %3056 = vsyncadd (!%p2708_p6), %s2313_s0, 4294967168  ;;  %s34_s20 = sadd.s32 1, %s3826_s27   ;;  %s3830_s27 = sld [smem:[#allocation19_spill]] }
 0xaec   : > { %p31_p7 = scmp.ge.s32.totalorder %s34_s20, 6   ;;  %s3831_s28 = sld [smem:[#allocation20_spill]] }
 0xaed   : > { %s3832_s29 = sld [smem:[#allocation28_spill]]  ;;  %s3833_s30 = sld [smem:[#allocation21_spill]] }
 0xaee   : > { %s3834_s0 = sld [smem:[#allocation22_spill]]  ;;  %s3835_s19 = sld [smem:[#allocation24_spill]] }
 0xaef   : > { %s3836_s1 = sld [smem:[#allocation26_spill]]  ;;  %33 = sbr.rel (!%p31_p7) target bundleno = 18 (0x12), region = 157 }
 0xaf6   :  { %2318 = vsyncpa [#allocation5], 1 }
 0xaf7   :  { %2320 = vsyncpa [#allocation5 + $0x1], 1 }
 0xaf8   :  { %2321 = vsyncpa [#allocation8], 1 }
 0xaf9   :  { %2322 = vsyncpa [#allocation11], 1 }
 0xafa   :  { %2323 = vsyncpa [#allocation6], 1 }
 0xafb   :  { %2325 = vsyncpa [#allocation6 + $0x1], 1 }

</bundles_post_ra>
